<compile_context>
chip_gen: v7x
topology: tpu7x:2x2x1
jax: 0.10.0
libtpu: 0.0.40
codegen_flags: <defaults>
</compile_context>

<pallas_src>
import jax
import jax.numpy as jnp
from jax import lax
from jax.experimental import pallas as pl
from jax.experimental.pallas import tpu as pltpu


def model_kernel(x_ref,                       # (T, Bp, in_size)  time-major
                 w1_ref, b1_ref,              # (in_size+H, 4H), (1, 4H)
                 gamma_ref, beta_ref,         # (1, H), (1, H)
                 w2_ref, b2_ref,              # (2H, 4H), (1, 4H)
                 wm1_ref, bm1_ref,            # (H, H), (1, H)
                 wm2_ref, bm2_ref,            # (H, OUTp), (1, OUTp)
                 out_ref):                    # (Bp, OUTp)
    T = x_ref.shape[0]
    Bp = x_ref.shape[1]
    H = gamma_ref.shape[-1]

    # Hoist all recurrence-invariant loads out of the time loop.
    w1 = w1_ref[...]
    b1 = b1_ref[...]
    w2 = w2_ref[...]
    b2 = b2_ref[...]
    gamma = gamma_ref[...]
    beta = beta_ref[...]

    def lstm_cell(xh, c, w, b):
        # One fused MXU matmul per cell: gates = [x, h] @ [[W_ih]; [W_hh]] + (b_ih + b_hh)
        gates = jnp.dot(xh, w, preferred_element_type=jnp.float32) + b
        # Two full-width EUP passes, then cheap slices (instead of 4 partial-vreg passes).
        sig = jax.nn.sigmoid(gates)
        tnh = jnp.tanh(gates)
        i = sig[:, 0 * H:1 * H]
        f = sig[:, 1 * H:2 * H]
        g = tnh[:, 2 * H:3 * H]
        o = sig[:, 3 * H:4 * H]
        c_new = f * c + i * g
        h_new = o * jnp.tanh(c_new)
        return h_new, c_new

    def step(t, carry):
        h1, c1, h2, c2 = carry
        x_t = x_ref[t]                                    # (Bp, in_size)

        # ---- LSTM layer 1 ----
        h1, c1 = lstm_cell(jnp.concatenate([x_t, h1], axis=-1), c1, w1, b1)

        # ---- LayerNorm over hidden dim (biased variance, eps=1e-5) ----
        mu = jnp.mean(h1, axis=-1, keepdims=True)
        var = jnp.mean((h1 - mu) ** 2, axis=-1, keepdims=True)
        xn = (h1 - mu) * lax.rsqrt(var + 1e-5) * gamma + beta
        # Dropout(0.1) is identity in eval mode.

        # ---- LSTM layer 2 ----
        h2, c2 = lstm_cell(jnp.concatenate([xn, h2], axis=-1), c2, w2, b2)
        return (h1, c1, h2, c2)

    zeros = jnp.zeros((Bp, H), jnp.float32)
    _, _, h2, _ = lax.fori_loop(0, T, step, (zeros, zeros, zeros, zeros),
                                unroll=True)

    # ---- MLP head on the last timestep's hidden state ----
    z = jnp.dot(h2, wm1_ref[...], preferred_element_type=jnp.float32) + bm1_ref[...]
    # Dropout(0.1) is identity in eval mode.
    y = jnp.dot(z, wm2_ref[...], preferred_element_type=jnp.float32) + bm2_ref[...]
    out_ref[...] = y.astype(out_ref.dtype)


def model_forward(x, params):
    B, T, in_size = x.shape
    H = params["whh1"].shape[0]
    out_notes = params["wm2"].shape[1]

    SUB, LANE = 8, 128
    Bp = ((B + SUB - 1) // SUB) * SUB          # pad batch to sublane boundary
    OUTp = ((out_notes + LANE - 1) // LANE) * LANE  # pad output to lane-dense width

    # Pad batch and go time-major: (T, Bp, in_size). Padded rows compute garbage
    # but are sliced away after the call.
    x_p = jnp.zeros((Bp, T, in_size), jnp.float32).at[:B].set(x.astype(jnp.float32))
    x_tm = jnp.transpose(x_p, (1, 0, 2))

    # Fuse LSTM input/hidden projections into a single weight per layer.
    w1 = jnp.concatenate([params["wih1"], params["whh1"]], axis=0)   # (in+H, 4H)
    w2 = jnp.concatenate([params["wih2"], params["whh2"]], axis=0)   # (2H, 4H)

    # Pad the final projection to OUTp lanes so the output store is unmasked.
    wm2 = jnp.zeros((H, OUTp), jnp.float32).at[:, :out_notes].set(params["wm2"])
    bm2 = jnp.zeros((1, OUTp), jnp.float32).at[:, :out_notes].set(params["bm2"])

    def full(shape):
        return pl.BlockSpec(shape, lambda i: (0,) * len(shape))

    out = pl.pallas_call(
        model_kernel,
        out_shape=jax.ShapeDtypeStruct((Bp, OUTp), jnp.float32),
        grid_spec=pltpu.PrefetchScalarGridSpec(
            num_scalar_prefetch=0,
            grid=(1,),
            in_specs=[
                full((T, Bp, in_size)),    # x (whole sequence resident in VMEM)
                full((in_size + H, 4 * H)),  # fused w1
                full((1, 4 * H)),            # b1 (= b_ih1 + b_hh1)
                full((1, H)),                # layernorm gamma
                full((1, H)),                # layernorm beta
                full((2 * H, 4 * H)),        # fused w2
                full((1, 4 * H)),            # b2
                full((H, H)),                # mlp w1
                full((1, H)),                # mlp b1
                full((H, OUTp)),             # mlp w2 (lane-padded)
                full((1, OUTp)),             # mlp b2 (lane-padded)
            ],
            out_specs=pl.BlockSpec((Bp, OUTp), lambda i: (0, 0)),
        ),
        compiler_params=pltpu.CompilerParams(
            dimension_semantics=("arbitrary",)),
    )(x_tm, w1, params["b1"], params["gamma"], params["beta"],
      w2, params["b2"], params["wm1"], params["bm1"], wm2, bm2)

    return out[:B, :out_notes]


def init_params(key, in_size, H, out_notes):
    ks = jax.random.split(key, 12)
    u = lambda k, shape, bound: jax.random.uniform(
        k, shape, jnp.float32, -bound, bound)
    s_lstm = 1.0 / jnp.sqrt(H)
    # LSTM1 (PyTorch stores (4H, in) / (4H, H); kept pre-transposed for x @ W)
    wih1 = u(ks[0], (in_size, 4 * H), s_lstm)
    whh1 = u(ks[1], (H, 4 * H), s_lstm)
    b1 = u(ks[2], (1, 4 * H), s_lstm) + u(ks[3], (1, 4 * H), s_lstm)
    # LayerNorm
    gamma = jnp.ones((1, H), jnp.float32)
    beta = jnp.zeros((1, H), jnp.float32)
    # LSTM2
    wih2 = u(ks[4], (H, 4 * H), s_lstm)
    whh2 = u(ks[5], (H, 4 * H), s_lstm)
    b2 = u(ks[6], (1, 4 * H), s_lstm) + u(ks[7], (1, 4 * H), s_lstm)
    # MLP
    s1 = 1.0 / jnp.sqrt(H)
    wm1 = u(ks[8], (H, H), s1)
    bm1 = u(ks[9], (1, H), s1)
    wm2 = u(ks[10], (H, out_notes), s1)
    bm2 = u(ks[11], (1, out_notes), s1)
    return dict(wih1=wih1, whh1=whh1, b1=b1, gamma=gamma, beta=beta,
                wih2=wih2, whh2=whh2, b2=b2,
                wm1=wm1, bm1=bm1, wm2=wm2, bm2=bm2)


if __name__ == "__main__":
    B, T, in_size, H, out_notes = 2, 8, 32, 32, 16
    key = jax.random.PRNGKey(0)
    kx, kp = jax.random.split(key)
    x = jax.random.normal(kx, (B, T, in_size), jnp.float32)
    params = init_params(kp, in_size, H, out_notes)

    out = model_forward(x, params)
    jax.block_until_ready(out)
    assert out.shape == (B, out_notes)
    print("KERNEL_OK")
</pallas_src>

<mosaic_0001>
module attributes {stable_mosaic.version = 11 : i64} {
  func.func @model_kernel(%arg0: i32, %arg1: memref<8x8x32xf32, #tpu.memory_space<vmem>>, %arg2: memref<64x128xf32, #tpu.memory_space<vmem>>, %arg3: memref<1x128xf32, #tpu.memory_space<vmem>>, %arg4: memref<1x32xf32, #tpu.memory_space<vmem>>, %arg5: memref<1x32xf32, #tpu.memory_space<vmem>>, %arg6: memref<64x128xf32, #tpu.memory_space<vmem>>, %arg7: memref<1x128xf32, #tpu.memory_space<vmem>>, %arg8: memref<32x32xf32, #tpu.memory_space<vmem>>, %arg9: memref<1x32xf32, #tpu.memory_space<vmem>>, %arg10: memref<32x128xf32, #tpu.memory_space<vmem>>, %arg11: memref<1x128xf32, #tpu.memory_space<vmem>>, %arg12: memref<8x128xf32, #tpu.memory_space<vmem>>) attributes {dimension_semantics = [#tpu.dimension_semantics<arbitrary>], iteration_bounds = array<i64: 1>, scalar_prefetch = 0 : i64, scratch_operands = 0 : i64, tpu.core_type = #tpu.core_type<tc>, window_params = [{pipeline_mode = #tpu.pipeline_mode<synchronous>, transform_indices = @transform_0, window_bounds = array<i64: 8, 8, 32>}, {pipeline_mode = #tpu.pipeline_mode<synchronous>, transform_indices = @transform_1, window_bounds = array<i64: 64, 128>}, {pipeline_mode = #tpu.pipeline_mode<synchronous>, transform_indices = @transform_2, window_bounds = array<i64: 1, 128>}, {pipeline_mode = #tpu.pipeline_mode<synchronous>, transform_indices = @transform_3, window_bounds = array<i64: 1, 32>}, {pipeline_mode = #tpu.pipeline_mode<synchronous>, transform_indices = @transform_4, window_bounds = array<i64: 1, 32>}, {pipeline_mode = #tpu.pipeline_mode<synchronous>, transform_indices = @transform_5, window_bounds = array<i64: 64, 128>}, {pipeline_mode = #tpu.pipeline_mode<synchronous>, transform_indices = @transform_6, window_bounds = array<i64: 1, 128>}, {pipeline_mode = #tpu.pipeline_mode<synchronous>, transform_indices = @transform_7, window_bounds = array<i64: 32, 32>}, {pipeline_mode = #tpu.pipeline_mode<synchronous>, transform_indices = @transform_8, window_bounds = array<i64: 1, 32>}, {pipeline_mode = #tpu.pipeline_mode<synchronous>, transform_indices = @transform_9, window_bounds = array<i64: 32, 128>}, {pipeline_mode = #tpu.pipeline_mode<synchronous>, transform_indices = @transform_10, window_bounds = array<i64: 1, 128>}, {pipeline_mode = #tpu.pipeline_mode<synchronous>, transform_indices = @transform_11, window_bounds = array<i64: 8, 128>}]} {
    %c0 = arith.constant 0 : index
    %c0_0 = arith.constant 0 : index
    %0 = vector.load %arg2[%c0, %c0_0] : memref<64x128xf32, #tpu.memory_space<vmem>>, vector<64x128xf32>
    %c0_1 = arith.constant 0 : index
    %c0_2 = arith.constant 0 : index
    %1 = vector.load %arg3[%c0_1, %c0_2] : memref<1x128xf32, #tpu.memory_space<vmem>>, vector<1x128xf32>
    %c0_3 = arith.constant 0 : index
    %c0_4 = arith.constant 0 : index
    %2 = vector.load %arg6[%c0_3, %c0_4] : memref<64x128xf32, #tpu.memory_space<vmem>>, vector<64x128xf32>
    %c0_5 = arith.constant 0 : index
    %c0_6 = arith.constant 0 : index
    %3 = vector.load %arg7[%c0_5, %c0_6] : memref<1x128xf32, #tpu.memory_space<vmem>>, vector<1x128xf32>
    %c0_7 = arith.constant 0 : index
    %c0_8 = arith.constant 0 : index
    %4 = vector.load %arg4[%c0_7, %c0_8] : memref<1x32xf32, #tpu.memory_space<vmem>>, vector<1x32xf32>
    %c0_9 = arith.constant 0 : index
    %c0_10 = arith.constant 0 : index
    %5 = vector.load %arg5[%c0_9, %c0_10] : memref<1x32xf32, #tpu.memory_space<vmem>>, vector<1x32xf32>
    %cst = arith.constant 0.000000e+00 : f32
    %6 = vector.broadcast %cst : f32 to vector<8x32xf32>
    %c0_i32 = arith.constant 0 : i32
    %7 = arith.index_cast %c0_i32 : i32 to index
    %c0_11 = arith.constant 0 : index
    %c0_12 = arith.constant 0 : index
    %8 = vector.load %arg1[%7, %c0_11, %c0_12] : memref<8x8x32xf32, #tpu.memory_space<vmem>>, vector<1x8x32xf32>
    %9 = vector.shape_cast %8 : vector<1x8x32xf32> to vector<8x32xf32>
    %10 = tpu.concatenate %9, %6 in 1 : vector<8x32xf32>, vector<8x32xf32> -> vector<8x64xf32>
    %cst_13 = arith.constant dense<0.000000e+00> : vector<8x128xf32>
    %11 = tpu.matmul %10, %0, %cst_13 {dimension_numbers = #tpu.dot_dimension_numbers<[1], [0], [0], [1], [0, 0, 1, 1], [], []>} : vector<8x64xf32>, vector<64x128xf32>, vector<8x128xf32> -> vector<8x128xf32>
    %12 = vector.broadcast %1 : vector<1x128xf32> to vector<8x128xf32>
    %13 = arith.addf %11, %12 : vector<8x128xf32>
    %14 = arith.negf %13 : vector<8x128xf32>
    %15 = math.exp %14 : vector<8x128xf32>
    %cst_14 = arith.constant 1.000000e+00 : f32
    %16 = vector.broadcast %cst_14 : f32 to vector<8x128xf32>
    %17 = arith.addf %16, %15 : vector<8x128xf32>
    %18 = arith.divf %16, %17 : vector<8x128xf32>
    %19 = math.tanh %13 : vector<8x128xf32>
    %20 = vector.extract_strided_slice %18 {offsets = [0, 0], sizes = [8, 32], strides = [1, 1]} : vector<8x128xf32> to vector<8x32xf32>
    %21 = vector.extract_strided_slice %18 {offsets = [0, 32], sizes = [8, 32], strides = [1, 1]} : vector<8x128xf32> to vector<8x32xf32>
    %22 = vector.extract_strided_slice %19 {offsets = [0, 64], sizes = [8, 32], strides = [1, 1]} : vector<8x128xf32> to vector<8x32xf32>
    %23 = vector.extract_strided_slice %18 {offsets = [0, 96], sizes = [8, 32], strides = [1, 1]} : vector<8x128xf32> to vector<8x32xf32>
    %24 = arith.mulf %21, %6 : vector<8x32xf32>
    %25 = arith.mulf %20, %22 : vector<8x32xf32>
    %26 = arith.addf %24, %25 : vector<8x32xf32>
    %27 = math.tanh %26 : vector<8x32xf32>
    %28 = arith.mulf %23, %27 : vector<8x32xf32>
    %cst_15 = arith.constant dense<0.000000e+00> : vector<8xf32>
    %29 = vector.multi_reduction <add>, %28, %cst_15 [1] : vector<8x32xf32> to vector<8xf32>
    %30 = vector.shape_cast %29 : vector<8xf32> to vector<8x1xf32>
    %cst_16 = arith.constant 3.200000e+01 : f32
    %31 = vector.broadcast %cst_16 : f32 to vector<8x1xf32>
    %32 = arith.divf %30, %31 : vector<8x1xf32>
    %33 = vector.broadcast %32 : vector<8x1xf32> to vector<8x32xf32>
    %34 = arith.subf %28, %33 : vector<8x32xf32>
    %35 = arith.mulf %34, %34 : vector<8x32xf32>
    %cst_17 = arith.constant dense<0.000000e+00> : vector<8xf32>
    %36 = vector.multi_reduction <add>, %35, %cst_17 [1] : vector<8x32xf32> to vector<8xf32>
    %37 = vector.shape_cast %36 : vector<8xf32> to vector<8x1xf32>
    %cst_18 = arith.constant 3.200000e+01 : f32
    %38 = vector.broadcast %cst_18 : f32 to vector<8x1xf32>
    %39 = arith.divf %37, %38 : vector<8x1xf32>
    %40 = vector.broadcast %32 : vector<8x1xf32> to vector<8x32xf32>
    %41 = arith.subf %28, %40 : vector<8x32xf32>
    %cst_19 = arith.constant 9.99999974E-6 : f32
    %42 = vector.broadcast %cst_19 : f32 to vector<8x1xf32>
    %43 = arith.addf %39, %42 : vector<8x1xf32>
    %44 = math.rsqrt %43 : vector<8x1xf32>
    %45 = vector.broadcast %44 : vector<8x1xf32> to vector<8x32xf32>
    %46 = arith.mulf %41, %45 : vector<8x32xf32>
    %47 = vector.broadcast %4 : vector<1x32xf32> to vector<8x32xf32>
    %48 = arith.mulf %46, %47 : vector<8x32xf32>
    %49 = vector.broadcast %5 : vector<1x32xf32> to vector<8x32xf32>
    %50 = arith.addf %48, %49 : vector<8x32xf32>
    %51 = tpu.concatenate %50, %6 in 1 : vector<8x32xf32>, vector<8x32xf32> -> vector<8x64xf32>
    %cst_20 = arith.constant dense<0.000000e+00> : vector<8x128xf32>
    %52 = tpu.matmul %51, %2, %cst_20 {dimension_numbers = #tpu.dot_dimension_numbers<[1], [0], [0], [1], [0, 0, 1, 1], [], []>} : vector<8x64xf32>, vector<64x128xf32>, vector<8x128xf32> -> vector<8x128xf32>
    %53 = vector.broadcast %3 : vector<1x128xf32> to vector<8x128xf32>
    %54 = arith.addf %52, %53 : vector<8x128xf32>
    %55 = arith.negf %54 : vector<8x128xf32>
    %56 = math.exp %55 : vector<8x128xf32>
    %cst_21 = arith.constant 1.000000e+00 : f32
    %57 = vector.broadcast %cst_21 : f32 to vector<8x128xf32>
    %58 = arith.addf %57, %56 : vector<8x128xf32>
    %59 = arith.divf %57, %58 : vector<8x128xf32>
    %60 = math.tanh %54 : vector<8x128xf32>
    %61 = vector.extract_strided_slice %59 {offsets = [0, 0], sizes = [8, 32], strides = [1, 1]} : vector<8x128xf32> to vector<8x32xf32>
    %62 = vector.extract_strided_slice %59 {offsets = [0, 32], sizes = [8, 32], strides = [1, 1]} : vector<8x128xf32> to vector<8x32xf32>
    %63 = vector.extract_strided_slice %60 {offsets = [0, 64], sizes = [8, 32], strides = [1, 1]} : vector<8x128xf32> to vector<8x32xf32>
    %64 = vector.extract_strided_slice %59 {offsets = [0, 96], sizes = [8, 32], strides = [1, 1]} : vector<8x128xf32> to vector<8x32xf32>
    %65 = arith.mulf %62, %6 : vector<8x32xf32>
    %66 = arith.mulf %61, %63 : vector<8x32xf32>
    %67 = arith.addf %65, %66 : vector<8x32xf32>
    %68 = math.tanh %67 : vector<8x32xf32>
    %69 = arith.mulf %64, %68 : vector<8x32xf32>
    %c1_i32 = arith.constant 1 : i32
    %70 = arith.index_cast %c1_i32 : i32 to index
    %c0_22 = arith.constant 0 : index
    %c0_23 = arith.constant 0 : index
    %71 = vector.load %arg1[%70, %c0_22, %c0_23] : memref<8x8x32xf32, #tpu.memory_space<vmem>>, vector<1x8x32xf32>
    %72 = vector.shape_cast %71 : vector<1x8x32xf32> to vector<8x32xf32>
    %73 = tpu.concatenate %72, %28 in 1 : vector<8x32xf32>, vector<8x32xf32> -> vector<8x64xf32>
    %cst_24 = arith.constant dense<0.000000e+00> : vector<8x128xf32>
    %74 = tpu.matmul %73, %0, %cst_24 {dimension_numbers = #tpu.dot_dimension_numbers<[1], [0], [0], [1], [0, 0, 1, 1], [], []>} : vector<8x64xf32>, vector<64x128xf32>, vector<8x128xf32> -> vector<8x128xf32>
    %75 = vector.broadcast %1 : vector<1x128xf32> to vector<8x128xf32>
    %76 = arith.addf %74, %75 : vector<8x128xf32>
    %77 = arith.negf %76 : vector<8x128xf32>
    %78 = math.exp %77 : vector<8x128xf32>
    %cst_25 = arith.constant 1.000000e+00 : f32
    %79 = vector.broadcast %cst_25 : f32 to vector<8x128xf32>
    %80 = arith.addf %79, %78 : vector<8x128xf32>
    %81 = arith.divf %79, %80 : vector<8x128xf32>
    %82 = math.tanh %76 : vector<8x128xf32>
    %83 = vector.extract_strided_slice %81 {offsets = [0, 0], sizes = [8, 32], strides = [1, 1]} : vector<8x128xf32> to vector<8x32xf32>
    %84 = vector.extract_strided_slice %81 {offsets = [0, 32], sizes = [8, 32], strides = [1, 1]} : vector<8x128xf32> to vector<8x32xf32>
    %85 = vector.extract_strided_slice %82 {offsets = [0, 64], sizes = [8, 32], strides = [1, 1]} : vector<8x128xf32> to vector<8x32xf32>
    %86 = vector.extract_strided_slice %81 {offsets = [0, 96], sizes = [8, 32], strides = [1, 1]} : vector<8x128xf32> to vector<8x32xf32>
    %87 = arith.mulf %84, %26 : vector<8x32xf32>
    %88 = arith.mulf %83, %85 : vector<8x32xf32>
    %89 = arith.addf %87, %88 : vector<8x32xf32>
    %90 = math.tanh %89 : vector<8x32xf32>
    %91 = arith.mulf %86, %90 : vector<8x32xf32>
    %cst_26 = arith.constant dense<0.000000e+00> : vector<8xf32>
    %92 = vector.multi_reduction <add>, %91, %cst_26 [1] : vector<8x32xf32> to vector<8xf32>
    %93 = vector.shape_cast %92 : vector<8xf32> to vector<8x1xf32>
    %cst_27 = arith.constant 3.200000e+01 : f32
    %94 = vector.broadcast %cst_27 : f32 to vector<8x1xf32>
    %95 = arith.divf %93, %94 : vector<8x1xf32>
    %96 = vector.broadcast %95 : vector<8x1xf32> to vector<8x32xf32>
    %97 = arith.subf %91, %96 : vector<8x32xf32>
    %98 = arith.mulf %97, %97 : vector<8x32xf32>
    %cst_28 = arith.constant dense<0.000000e+00> : vector<8xf32>
    %99 = vector.multi_reduction <add>, %98, %cst_28 [1] : vector<8x32xf32> to vector<8xf32>
    %100 = vector.shape_cast %99 : vector<8xf32> to vector<8x1xf32>
    %cst_29 = arith.constant 3.200000e+01 : f32
    %101 = vector.broadcast %cst_29 : f32 to vector<8x1xf32>
    %102 = arith.divf %100, %101 : vector<8x1xf32>
    %103 = vector.broadcast %95 : vector<8x1xf32> to vector<8x32xf32>
    %104 = arith.subf %91, %103 : vector<8x32xf32>
    %cst_30 = arith.constant 9.99999974E-6 : f32
    %105 = vector.broadcast %cst_30 : f32 to vector<8x1xf32>
    %106 = arith.addf %102, %105 : vector<8x1xf32>
    %107 = math.rsqrt %106 : vector<8x1xf32>
    %108 = vector.broadcast %107 : vector<8x1xf32> to vector<8x32xf32>
    %109 = arith.mulf %104, %108 : vector<8x32xf32>
    %110 = vector.broadcast %4 : vector<1x32xf32> to vector<8x32xf32>
    %111 = arith.mulf %109, %110 : vector<8x32xf32>
    %112 = vector.broadcast %5 : vector<1x32xf32> to vector<8x32xf32>
    %113 = arith.addf %111, %112 : vector<8x32xf32>
    %114 = tpu.concatenate %113, %69 in 1 : vector<8x32xf32>, vector<8x32xf32> -> vector<8x64xf32>
    %cst_31 = arith.constant dense<0.000000e+00> : vector<8x128xf32>
    %115 = tpu.matmul %114, %2, %cst_31 {dimension_numbers = #tpu.dot_dimension_numbers<[1], [0], [0], [1], [0, 0, 1, 1], [], []>} : vector<8x64xf32>, vector<64x128xf32>, vector<8x128xf32> -> vector<8x128xf32>
    %116 = vector.broadcast %3 : vector<1x128xf32> to vector<8x128xf32>
    %117 = arith.addf %115, %116 : vector<8x128xf32>
    %118 = arith.negf %117 : vector<8x128xf32>
    %119 = math.exp %118 : vector<8x128xf32>
    %cst_32 = arith.constant 1.000000e+00 : f32
    %120 = vector.broadcast %cst_32 : f32 to vector<8x128xf32>
    %121 = arith.addf %120, %119 : vector<8x128xf32>
    %122 = arith.divf %120, %121 : vector<8x128xf32>
    %123 = math.tanh %117 : vector<8x128xf32>
    %124 = vector.extract_strided_slice %122 {offsets = [0, 0], sizes = [8, 32], strides = [1, 1]} : vector<8x128xf32> to vector<8x32xf32>
    %125 = vector.extract_strided_slice %122 {offsets = [0, 32], sizes = [8, 32], strides = [1, 1]} : vector<8x128xf32> to vector<8x32xf32>
    %126 = vector.extract_strided_slice %123 {offsets = [0, 64], sizes = [8, 32], strides = [1, 1]} : vector<8x128xf32> to vector<8x32xf32>
    %127 = vector.extract_strided_slice %122 {offsets = [0, 96], sizes = [8, 32], strides = [1, 1]} : vector<8x128xf32> to vector<8x32xf32>
    %128 = arith.mulf %125, %67 : vector<8x32xf32>
    %129 = arith.mulf %124, %126 : vector<8x32xf32>
    %130 = arith.addf %128, %129 : vector<8x32xf32>
    %131 = math.tanh %130 : vector<8x32xf32>
    %132 = arith.mulf %127, %131 : vector<8x32xf32>
    %c2_i32 = arith.constant 2 : i32
    %133 = arith.index_cast %c2_i32 : i32 to index
    %c0_33 = arith.constant 0 : index
    %c0_34 = arith.constant 0 : index
    %134 = vector.load %arg1[%133, %c0_33, %c0_34] : memref<8x8x32xf32, #tpu.memory_space<vmem>>, vector<1x8x32xf32>
    %135 = vector.shape_cast %134 : vector<1x8x32xf32> to vector<8x32xf32>
    %136 = tpu.concatenate %135, %91 in 1 : vector<8x32xf32>, vector<8x32xf32> -> vector<8x64xf32>
    %cst_35 = arith.constant dense<0.000000e+00> : vector<8x128xf32>
    %137 = tpu.matmul %136, %0, %cst_35 {dimension_numbers = #tpu.dot_dimension_numbers<[1], [0], [0], [1], [0, 0, 1, 1], [], []>} : vector<8x64xf32>, vector<64x128xf32>, vector<8x128xf32> -> vector<8x128xf32>
    %138 = vector.broadcast %1 : vector<1x128xf32> to vector<8x128xf32>
    %139 = arith.addf %137, %138 : vector<8x128xf32>
    %140 = arith.negf %139 : vector<8x128xf32>
    %141 = math.exp %140 : vector<8x128xf32>
    %cst_36 = arith.constant 1.000000e+00 : f32
    %142 = vector.broadcast %cst_36 : f32 to vector<8x128xf32>
    %143 = arith.addf %142, %141 : vector<8x128xf32>
    %144 = arith.divf %142, %143 : vector<8x128xf32>
    %145 = math.tanh %139 : vector<8x128xf32>
    %146 = vector.extract_strided_slice %144 {offsets = [0, 0], sizes = [8, 32], strides = [1, 1]} : vector<8x128xf32> to vector<8x32xf32>
    %147 = vector.extract_strided_slice %144 {offsets = [0, 32], sizes = [8, 32], strides = [1, 1]} : vector<8x128xf32> to vector<8x32xf32>
    %148 = vector.extract_strided_slice %145 {offsets = [0, 64], sizes = [8, 32], strides = [1, 1]} : vector<8x128xf32> to vector<8x32xf32>
    %149 = vector.extract_strided_slice %144 {offsets = [0, 96], sizes = [8, 32], strides = [1, 1]} : vector<8x128xf32> to vector<8x32xf32>
    %150 = arith.mulf %147, %89 : vector<8x32xf32>
    %151 = arith.mulf %146, %148 : vector<8x32xf32>
    %152 = arith.addf %150, %151 : vector<8x32xf32>
    %153 = math.tanh %152 : vector<8x32xf32>
    %154 = arith.mulf %149, %153 : vector<8x32xf32>
    %cst_37 = arith.constant dense<0.000000e+00> : vector<8xf32>
    %155 = vector.multi_reduction <add>, %154, %cst_37 [1] : vector<8x32xf32> to vector<8xf32>
    %156 = vector.shape_cast %155 : vector<8xf32> to vector<8x1xf32>
    %cst_38 = arith.constant 3.200000e+01 : f32
    %157 = vector.broadcast %cst_38 : f32 to vector<8x1xf32>
    %158 = arith.divf %156, %157 : vector<8x1xf32>
    %159 = vector.broadcast %158 : vector<8x1xf32> to vector<8x32xf32>
    %160 = arith.subf %154, %159 : vector<8x32xf32>
    %161 = arith.mulf %160, %160 : vector<8x32xf32>
    %cst_39 = arith.constant dense<0.000000e+00> : vector<8xf32>
    %162 = vector.multi_reduction <add>, %161, %cst_39 [1] : vector<8x32xf32> to vector<8xf32>
    %163 = vector.shape_cast %162 : vector<8xf32> to vector<8x1xf32>
    %cst_40 = arith.constant 3.200000e+01 : f32
    %164 = vector.broadcast %cst_40 : f32 to vector<8x1xf32>
    %165 = arith.divf %163, %164 : vector<8x1xf32>
    %166 = vector.broadcast %158 : vector<8x1xf32> to vector<8x32xf32>
    %167 = arith.subf %154, %166 : vector<8x32xf32>
    %cst_41 = arith.constant 9.99999974E-6 : f32
    %168 = vector.broadcast %cst_41 : f32 to vector<8x1xf32>
    %169 = arith.addf %165, %168 : vector<8x1xf32>
    %170 = math.rsqrt %169 : vector<8x1xf32>
    %171 = vector.broadcast %170 : vector<8x1xf32> to vector<8x32xf32>
    %172 = arith.mulf %167, %171 : vector<8x32xf32>
    %173 = vector.broadcast %4 : vector<1x32xf32> to vector<8x32xf32>
    %174 = arith.mulf %172, %173 : vector<8x32xf32>
    %175 = vector.broadcast %5 : vector<1x32xf32> to vector<8x32xf32>
    %176 = arith.addf %174, %175 : vector<8x32xf32>
    %177 = tpu.concatenate %176, %132 in 1 : vector<8x32xf32>, vector<8x32xf32> -> vector<8x64xf32>
    %cst_42 = arith.constant dense<0.000000e+00> : vector<8x128xf32>
    %178 = tpu.matmul %177, %2, %cst_42 {dimension_numbers = #tpu.dot_dimension_numbers<[1], [0], [0], [1], [0, 0, 1, 1], [], []>} : vector<8x64xf32>, vector<64x128xf32>, vector<8x128xf32> -> vector<8x128xf32>
    %179 = vector.broadcast %3 : vector<1x128xf32> to vector<8x128xf32>
    %180 = arith.addf %178, %179 : vector<8x128xf32>
    %181 = arith.negf %180 : vector<8x128xf32>
    %182 = math.exp %181 : vector<8x128xf32>
    %cst_43 = arith.constant 1.000000e+00 : f32
    %183 = vector.broadcast %cst_43 : f32 to vector<8x128xf32>
    %184 = arith.addf %183, %182 : vector<8x128xf32>
    %185 = arith.divf %183, %184 : vector<8x128xf32>
    %186 = math.tanh %180 : vector<8x128xf32>
    %187 = vector.extract_strided_slice %185 {offsets = [0, 0], sizes = [8, 32], strides = [1, 1]} : vector<8x128xf32> to vector<8x32xf32>
    %188 = vector.extract_strided_slice %185 {offsets = [0, 32], sizes = [8, 32], strides = [1, 1]} : vector<8x128xf32> to vector<8x32xf32>
    %189 = vector.extract_strided_slice %186 {offsets = [0, 64], sizes = [8, 32], strides = [1, 1]} : vector<8x128xf32> to vector<8x32xf32>
    %190 = vector.extract_strided_slice %185 {offsets = [0, 96], sizes = [8, 32], strides = [1, 1]} : vector<8x128xf32> to vector<8x32xf32>
    %191 = arith.mulf %188, %130 : vector<8x32xf32>
    %192 = arith.mulf %187, %189 : vector<8x32xf32>
    %193 = arith.addf %191, %192 : vector<8x32xf32>
    %194 = math.tanh %193 : vector<8x32xf32>
    %195 = arith.mulf %190, %194 : vector<8x32xf32>
    %c3_i32 = arith.constant 3 : i32
    %196 = arith.index_cast %c3_i32 : i32 to index
    %c0_44 = arith.constant 0 : index
    %c0_45 = arith.constant 0 : index
    %197 = vector.load %arg1[%196, %c0_44, %c0_45] : memref<8x8x32xf32, #tpu.memory_space<vmem>>, vector<1x8x32xf32>
    %198 = vector.shape_cast %197 : vector<1x8x32xf32> to vector<8x32xf32>
    %199 = tpu.concatenate %198, %154 in 1 : vector<8x32xf32>, vector<8x32xf32> -> vector<8x64xf32>
    %cst_46 = arith.constant dense<0.000000e+00> : vector<8x128xf32>
    %200 = tpu.matmul %199, %0, %cst_46 {dimension_numbers = #tpu.dot_dimension_numbers<[1], [0], [0], [1], [0, 0, 1, 1], [], []>} : vector<8x64xf32>, vector<64x128xf32>, vector<8x128xf32> -> vector<8x128xf32>
    %201 = vector.broadcast %1 : vector<1x128xf32> to vector<8x128xf32>
    %202 = arith.addf %200, %201 : vector<8x128xf32>
    %203 = arith.negf %202 : vector<8x128xf32>
    %204 = math.exp %203 : vector<8x128xf32>
    %cst_47 = arith.constant 1.000000e+00 : f32
    %205 = vector.broadcast %cst_47 : f32 to vector<8x128xf32>
    %206 = arith.addf %205, %204 : vector<8x128xf32>
    %207 = arith.divf %205, %206 : vector<8x128xf32>
    %208 = math.tanh %202 : vector<8x128xf32>
    %209 = vector.extract_strided_slice %207 {offsets = [0, 0], sizes = [8, 32], strides = [1, 1]} : vector<8x128xf32> to vector<8x32xf32>
    %210 = vector.extract_strided_slice %207 {offsets = [0, 32], sizes = [8, 32], strides = [1, 1]} : vector<8x128xf32> to vector<8x32xf32>
    %211 = vector.extract_strided_slice %208 {offsets = [0, 64], sizes = [8, 32], strides = [1, 1]} : vector<8x128xf32> to vector<8x32xf32>
    %212 = vector.extract_strided_slice %207 {offsets = [0, 96], sizes = [8, 32], strides = [1, 1]} : vector<8x128xf32> to vector<8x32xf32>
    %213 = arith.mulf %210, %152 : vector<8x32xf32>
    %214 = arith.mulf %209, %211 : vector<8x32xf32>
    %215 = arith.addf %213, %214 : vector<8x32xf32>
    %216 = math.tanh %215 : vector<8x32xf32>
    %217 = arith.mulf %212, %216 : vector<8x32xf32>
    %cst_48 = arith.constant dense<0.000000e+00> : vector<8xf32>
    %218 = vector.multi_reduction <add>, %217, %cst_48 [1] : vector<8x32xf32> to vector<8xf32>
    %219 = vector.shape_cast %218 : vector<8xf32> to vector<8x1xf32>
    %cst_49 = arith.constant 3.200000e+01 : f32
    %220 = vector.broadcast %cst_49 : f32 to vector<8x1xf32>
    %221 = arith.divf %219, %220 : vector<8x1xf32>
    %222 = vector.broadcast %221 : vector<8x1xf32> to vector<8x32xf32>
    %223 = arith.subf %217, %222 : vector<8x32xf32>
    %224 = arith.mulf %223, %223 : vector<8x32xf32>
    %cst_50 = arith.constant dense<0.000000e+00> : vector<8xf32>
    %225 = vector.multi_reduction <add>, %224, %cst_50 [1] : vector<8x32xf32> to vector<8xf32>
    %226 = vector.shape_cast %225 : vector<8xf32> to vector<8x1xf32>
    %cst_51 = arith.constant 3.200000e+01 : f32
    %227 = vector.broadcast %cst_51 : f32 to vector<8x1xf32>
    %228 = arith.divf %226, %227 : vector<8x1xf32>
    %229 = vector.broadcast %221 : vector<8x1xf32> to vector<8x32xf32>
    %230 = arith.subf %217, %229 : vector<8x32xf32>
    %cst_52 = arith.constant 9.99999974E-6 : f32
    %231 = vector.broadcast %cst_52 : f32 to vector<8x1xf32>
    %232 = arith.addf %228, %231 : vector<8x1xf32>
    %233 = math.rsqrt %232 : vector<8x1xf32>
    %234 = vector.broadcast %233 : vector<8x1xf32> to vector<8x32xf32>
    %235 = arith.mulf %230, %234 : vector<8x32xf32>
    %236 = vector.broadcast %4 : vector<1x32xf32> to vector<8x32xf32>
    %237 = arith.mulf %235, %236 : vector<8x32xf32>
    %238 = vector.broadcast %5 : vector<1x32xf32> to vector<8x32xf32>
    %239 = arith.addf %237, %238 : vector<8x32xf32>
    %240 = tpu.concatenate %239, %195 in 1 : vector<8x32xf32>, vector<8x32xf32> -> vector<8x64xf32>
    %cst_53 = arith.constant dense<0.000000e+00> : vector<8x128xf32>
    %241 = tpu.matmul %240, %2, %cst_53 {dimension_numbers = #tpu.dot_dimension_numbers<[1], [0], [0], [1], [0, 0, 1, 1], [], []>} : vector<8x64xf32>, vector<64x128xf32>, vector<8x128xf32> -> vector<8x128xf32>
    %242 = vector.broadcast %3 : vector<1x128xf32> to vector<8x128xf32>
    %243 = arith.addf %241, %242 : vector<8x128xf32>
    %244 = arith.negf %243 : vector<8x128xf32>
    %245 = math.exp %244 : vector<8x128xf32>
    %cst_54 = arith.constant 1.000000e+00 : f32
    %246 = vector.broadcast %cst_54 : f32 to vector<8x128xf32>
    %247 = arith.addf %246, %245 : vector<8x128xf32>
    %248 = arith.divf %246, %247 : vector<8x128xf32>
    %249 = math.tanh %243 : vector<8x128xf32>
    %250 = vector.extract_strided_slice %248 {offsets = [0, 0], sizes = [8, 32], strides = [1, 1]} : vector<8x128xf32> to vector<8x32xf32>
    %251 = vector.extract_strided_slice %248 {offsets = [0, 32], sizes = [8, 32], strides = [1, 1]} : vector<8x128xf32> to vector<8x32xf32>
    %252 = vector.extract_strided_slice %249 {offsets = [0, 64], sizes = [8, 32], strides = [1, 1]} : vector<8x128xf32> to vector<8x32xf32>
    %253 = vector.extract_strided_slice %248 {offsets = [0, 96], sizes = [8, 32], strides = [1, 1]} : vector<8x128xf32> to vector<8x32xf32>
    %254 = arith.mulf %251, %193 : vector<8x32xf32>
    %255 = arith.mulf %250, %252 : vector<8x32xf32>
    %256 = arith.addf %254, %255 : vector<8x32xf32>
    %257 = math.tanh %256 : vector<8x32xf32>
    %258 = arith.mulf %253, %257 : vector<8x32xf32>
    %c4_i32 = arith.constant 4 : i32
    %259 = arith.index_cast %c4_i32 : i32 to index
    %c0_55 = arith.constant 0 : index
    %c0_56 = arith.constant 0 : index
    %260 = vector.load %arg1[%259, %c0_55, %c0_56] : memref<8x8x32xf32, #tpu.memory_space<vmem>>, vector<1x8x32xf32>
    %261 = vector.shape_cast %260 : vector<1x8x32xf32> to vector<8x32xf32>
    %262 = tpu.concatenate %261, %217 in 1 : vector<8x32xf32>, vector<8x32xf32> -> vector<8x64xf32>
    %cst_57 = arith.constant dense<0.000000e+00> : vector<8x128xf32>
    %263 = tpu.matmul %262, %0, %cst_57 {dimension_numbers = #tpu.dot_dimension_numbers<[1], [0], [0], [1], [0, 0, 1, 1], [], []>} : vector<8x64xf32>, vector<64x128xf32>, vector<8x128xf32> -> vector<8x128xf32>
    %264 = vector.broadcast %1 : vector<1x128xf32> to vector<8x128xf32>
    %265 = arith.addf %263, %264 : vector<8x128xf32>
    %266 = arith.negf %265 : vector<8x128xf32>
    %267 = math.exp %266 : vector<8x128xf32>
    %cst_58 = arith.constant 1.000000e+00 : f32
    %268 = vector.broadcast %cst_58 : f32 to vector<8x128xf32>
    %269 = arith.addf %268, %267 : vector<8x128xf32>
    %270 = arith.divf %268, %269 : vector<8x128xf32>
    %271 = math.tanh %265 : vector<8x128xf32>
    %272 = vector.extract_strided_slice %270 {offsets = [0, 0], sizes = [8, 32], strides = [1, 1]} : vector<8x128xf32> to vector<8x32xf32>
    %273 = vector.extract_strided_slice %270 {offsets = [0, 32], sizes = [8, 32], strides = [1, 1]} : vector<8x128xf32> to vector<8x32xf32>
    %274 = vector.extract_strided_slice %271 {offsets = [0, 64], sizes = [8, 32], strides = [1, 1]} : vector<8x128xf32> to vector<8x32xf32>
    %275 = vector.extract_strided_slice %270 {offsets = [0, 96], sizes = [8, 32], strides = [1, 1]} : vector<8x128xf32> to vector<8x32xf32>
    %276 = arith.mulf %273, %215 : vector<8x32xf32>
    %277 = arith.mulf %272, %274 : vector<8x32xf32>
    %278 = arith.addf %276, %277 : vector<8x32xf32>
    %279 = math.tanh %278 : vector<8x32xf32>
    %280 = arith.mulf %275, %279 : vector<8x32xf32>
    %cst_59 = arith.constant dense<0.000000e+00> : vector<8xf32>
    %281 = vector.multi_reduction <add>, %280, %cst_59 [1] : vector<8x32xf32> to vector<8xf32>
    %282 = vector.shape_cast %281 : vector<8xf32> to vector<8x1xf32>
    %cst_60 = arith.constant 3.200000e+01 : f32
    %283 = vector.broadcast %cst_60 : f32 to vector<8x1xf32>
    %284 = arith.divf %282, %283 : vector<8x1xf32>
    %285 = vector.broadcast %284 : vector<8x1xf32> to vector<8x32xf32>
    %286 = arith.subf %280, %285 : vector<8x32xf32>
    %287 = arith.mulf %286, %286 : vector<8x32xf32>
    %cst_61 = arith.constant dense<0.000000e+00> : vector<8xf32>
    %288 = vector.multi_reduction <add>, %287, %cst_61 [1] : vector<8x32xf32> to vector<8xf32>
    %289 = vector.shape_cast %288 : vector<8xf32> to vector<8x1xf32>
    %cst_62 = arith.constant 3.200000e+01 : f32
    %290 = vector.broadcast %cst_62 : f32 to vector<8x1xf32>
    %291 = arith.divf %289, %290 : vector<8x1xf32>
    %292 = vector.broadcast %284 : vector<8x1xf32> to vector<8x32xf32>
    %293 = arith.subf %280, %292 : vector<8x32xf32>
    %cst_63 = arith.constant 9.99999974E-6 : f32
    %294 = vector.broadcast %cst_63 : f32 to vector<8x1xf32>
    %295 = arith.addf %291, %294 : vector<8x1xf32>
    %296 = math.rsqrt %295 : vector<8x1xf32>
    %297 = vector.broadcast %296 : vector<8x1xf32> to vector<8x32xf32>
    %298 = arith.mulf %293, %297 : vector<8x32xf32>
    %299 = vector.broadcast %4 : vector<1x32xf32> to vector<8x32xf32>
    %300 = arith.mulf %298, %299 : vector<8x32xf32>
    %301 = vector.broadcast %5 : vector<1x32xf32> to vector<8x32xf32>
    %302 = arith.addf %300, %301 : vector<8x32xf32>
    %303 = tpu.concatenate %302, %258 in 1 : vector<8x32xf32>, vector<8x32xf32> -> vector<8x64xf32>
    %cst_64 = arith.constant dense<0.000000e+00> : vector<8x128xf32>
    %304 = tpu.matmul %303, %2, %cst_64 {dimension_numbers = #tpu.dot_dimension_numbers<[1], [0], [0], [1], [0, 0, 1, 1], [], []>} : vector<8x64xf32>, vector<64x128xf32>, vector<8x128xf32> -> vector<8x128xf32>
    %305 = vector.broadcast %3 : vector<1x128xf32> to vector<8x128xf32>
    %306 = arith.addf %304, %305 : vector<8x128xf32>
    %307 = arith.negf %306 : vector<8x128xf32>
    %308 = math.exp %307 : vector<8x128xf32>
    %cst_65 = arith.constant 1.000000e+00 : f32
    %309 = vector.broadcast %cst_65 : f32 to vector<8x128xf32>
    %310 = arith.addf %309, %308 : vector<8x128xf32>
    %311 = arith.divf %309, %310 : vector<8x128xf32>
    %312 = math.tanh %306 : vector<8x128xf32>
    %313 = vector.extract_strided_slice %311 {offsets = [0, 0], sizes = [8, 32], strides = [1, 1]} : vector<8x128xf32> to vector<8x32xf32>
    %314 = vector.extract_strided_slice %311 {offsets = [0, 32], sizes = [8, 32], strides = [1, 1]} : vector<8x128xf32> to vector<8x32xf32>
    %315 = vector.extract_strided_slice %312 {offsets = [0, 64], sizes = [8, 32], strides = [1, 1]} : vector<8x128xf32> to vector<8x32xf32>
    %316 = vector.extract_strided_slice %311 {offsets = [0, 96], sizes = [8, 32], strides = [1, 1]} : vector<8x128xf32> to vector<8x32xf32>
    %317 = arith.mulf %314, %256 : vector<8x32xf32>
    %318 = arith.mulf %313, %315 : vector<8x32xf32>
    %319 = arith.addf %317, %318 : vector<8x32xf32>
    %320 = math.tanh %319 : vector<8x32xf32>
    %321 = arith.mulf %316, %320 : vector<8x32xf32>
    %c5_i32 = arith.constant 5 : i32
    %322 = arith.index_cast %c5_i32 : i32 to index
    %c0_66 = arith.constant 0 : index
    %c0_67 = arith.constant 0 : index
    %323 = vector.load %arg1[%322, %c0_66, %c0_67] : memref<8x8x32xf32, #tpu.memory_space<vmem>>, vector<1x8x32xf32>
    %324 = vector.shape_cast %323 : vector<1x8x32xf32> to vector<8x32xf32>
    %325 = tpu.concatenate %324, %280 in 1 : vector<8x32xf32>, vector<8x32xf32> -> vector<8x64xf32>
    %cst_68 = arith.constant dense<0.000000e+00> : vector<8x128xf32>
    %326 = tpu.matmul %325, %0, %cst_68 {dimension_numbers = #tpu.dot_dimension_numbers<[1], [0], [0], [1], [0, 0, 1, 1], [], []>} : vector<8x64xf32>, vector<64x128xf32>, vector<8x128xf32> -> vector<8x128xf32>
    %327 = vector.broadcast %1 : vector<1x128xf32> to vector<8x128xf32>
    %328 = arith.addf %326, %327 : vector<8x128xf32>
    %329 = arith.negf %328 : vector<8x128xf32>
    %330 = math.exp %329 : vector<8x128xf32>
    %cst_69 = arith.constant 1.000000e+00 : f32
    %331 = vector.broadcast %cst_69 : f32 to vector<8x128xf32>
    %332 = arith.addf %331, %330 : vector<8x128xf32>
    %333 = arith.divf %331, %332 : vector<8x128xf32>
    %334 = math.tanh %328 : vector<8x128xf32>
    %335 = vector.extract_strided_slice %333 {offsets = [0, 0], sizes = [8, 32], strides = [1, 1]} : vector<8x128xf32> to vector<8x32xf32>
    %336 = vector.extract_strided_slice %333 {offsets = [0, 32], sizes = [8, 32], strides = [1, 1]} : vector<8x128xf32> to vector<8x32xf32>
    %337 = vector.extract_strided_slice %334 {offsets = [0, 64], sizes = [8, 32], strides = [1, 1]} : vector<8x128xf32> to vector<8x32xf32>
    %338 = vector.extract_strided_slice %333 {offsets = [0, 96], sizes = [8, 32], strides = [1, 1]} : vector<8x128xf32> to vector<8x32xf32>
    %339 = arith.mulf %336, %278 : vector<8x32xf32>
    %340 = arith.mulf %335, %337 : vector<8x32xf32>
    %341 = arith.addf %339, %340 : vector<8x32xf32>
    %342 = math.tanh %341 : vector<8x32xf32>
    %343 = arith.mulf %338, %342 : vector<8x32xf32>
    %cst_70 = arith.constant dense<0.000000e+00> : vector<8xf32>
    %344 = vector.multi_reduction <add>, %343, %cst_70 [1] : vector<8x32xf32> to vector<8xf32>
    %345 = vector.shape_cast %344 : vector<8xf32> to vector<8x1xf32>
    %cst_71 = arith.constant 3.200000e+01 : f32
    %346 = vector.broadcast %cst_71 : f32 to vector<8x1xf32>
    %347 = arith.divf %345, %346 : vector<8x1xf32>
    %348 = vector.broadcast %347 : vector<8x1xf32> to vector<8x32xf32>
    %349 = arith.subf %343, %348 : vector<8x32xf32>
    %350 = arith.mulf %349, %349 : vector<8x32xf32>
    %cst_72 = arith.constant dense<0.000000e+00> : vector<8xf32>
    %351 = vector.multi_reduction <add>, %350, %cst_72 [1] : vector<8x32xf32> to vector<8xf32>
    %352 = vector.shape_cast %351 : vector<8xf32> to vector<8x1xf32>
    %cst_73 = arith.constant 3.200000e+01 : f32
    %353 = vector.broadcast %cst_73 : f32 to vector<8x1xf32>
    %354 = arith.divf %352, %353 : vector<8x1xf32>
    %355 = vector.broadcast %347 : vector<8x1xf32> to vector<8x32xf32>
    %356 = arith.subf %343, %355 : vector<8x32xf32>
    %cst_74 = arith.constant 9.99999974E-6 : f32
    %357 = vector.broadcast %cst_74 : f32 to vector<8x1xf32>
    %358 = arith.addf %354, %357 : vector<8x1xf32>
    %359 = math.rsqrt %358 : vector<8x1xf32>
    %360 = vector.broadcast %359 : vector<8x1xf32> to vector<8x32xf32>
    %361 = arith.mulf %356, %360 : vector<8x32xf32>
    %362 = vector.broadcast %4 : vector<1x32xf32> to vector<8x32xf32>
    %363 = arith.mulf %361, %362 : vector<8x32xf32>
    %364 = vector.broadcast %5 : vector<1x32xf32> to vector<8x32xf32>
    %365 = arith.addf %363, %364 : vector<8x32xf32>
    %366 = tpu.concatenate %365, %321 in 1 : vector<8x32xf32>, vector<8x32xf32> -> vector<8x64xf32>
    %cst_75 = arith.constant dense<0.000000e+00> : vector<8x128xf32>
    %367 = tpu.matmul %366, %2, %cst_75 {dimension_numbers = #tpu.dot_dimension_numbers<[1], [0], [0], [1], [0, 0, 1, 1], [], []>} : vector<8x64xf32>, vector<64x128xf32>, vector<8x128xf32> -> vector<8x128xf32>
    %368 = vector.broadcast %3 : vector<1x128xf32> to vector<8x128xf32>
    %369 = arith.addf %367, %368 : vector<8x128xf32>
    %370 = arith.negf %369 : vector<8x128xf32>
    %371 = math.exp %370 : vector<8x128xf32>
    %cst_76 = arith.constant 1.000000e+00 : f32
    %372 = vector.broadcast %cst_76 : f32 to vector<8x128xf32>
    %373 = arith.addf %372, %371 : vector<8x128xf32>
    %374 = arith.divf %372, %373 : vector<8x128xf32>
    %375 = math.tanh %369 : vector<8x128xf32>
    %376 = vector.extract_strided_slice %374 {offsets = [0, 0], sizes = [8, 32], strides = [1, 1]} : vector<8x128xf32> to vector<8x32xf32>
    %377 = vector.extract_strided_slice %374 {offsets = [0, 32], sizes = [8, 32], strides = [1, 1]} : vector<8x128xf32> to vector<8x32xf32>
    %378 = vector.extract_strided_slice %375 {offsets = [0, 64], sizes = [8, 32], strides = [1, 1]} : vector<8x128xf32> to vector<8x32xf32>
    %379 = vector.extract_strided_slice %374 {offsets = [0, 96], sizes = [8, 32], strides = [1, 1]} : vector<8x128xf32> to vector<8x32xf32>
    %380 = arith.mulf %377, %319 : vector<8x32xf32>
    %381 = arith.mulf %376, %378 : vector<8x32xf32>
    %382 = arith.addf %380, %381 : vector<8x32xf32>
    %383 = math.tanh %382 : vector<8x32xf32>
    %384 = arith.mulf %379, %383 : vector<8x32xf32>
    %c6_i32 = arith.constant 6 : i32
    %385 = arith.index_cast %c6_i32 : i32 to index
    %c0_77 = arith.constant 0 : index
    %c0_78 = arith.constant 0 : index
    %386 = vector.load %arg1[%385, %c0_77, %c0_78] : memref<8x8x32xf32, #tpu.memory_space<vmem>>, vector<1x8x32xf32>
    %387 = vector.shape_cast %386 : vector<1x8x32xf32> to vector<8x32xf32>
    %388 = tpu.concatenate %387, %343 in 1 : vector<8x32xf32>, vector<8x32xf32> -> vector<8x64xf32>
    %cst_79 = arith.constant dense<0.000000e+00> : vector<8x128xf32>
    %389 = tpu.matmul %388, %0, %cst_79 {dimension_numbers = #tpu.dot_dimension_numbers<[1], [0], [0], [1], [0, 0, 1, 1], [], []>} : vector<8x64xf32>, vector<64x128xf32>, vector<8x128xf32> -> vector<8x128xf32>
    %390 = vector.broadcast %1 : vector<1x128xf32> to vector<8x128xf32>
    %391 = arith.addf %389, %390 : vector<8x128xf32>
    %392 = arith.negf %391 : vector<8x128xf32>
    %393 = math.exp %392 : vector<8x128xf32>
    %cst_80 = arith.constant 1.000000e+00 : f32
    %394 = vector.broadcast %cst_80 : f32 to vector<8x128xf32>
    %395 = arith.addf %394, %393 : vector<8x128xf32>
    %396 = arith.divf %394, %395 : vector<8x128xf32>
    %397 = math.tanh %391 : vector<8x128xf32>
    %398 = vector.extract_strided_slice %396 {offsets = [0, 0], sizes = [8, 32], strides = [1, 1]} : vector<8x128xf32> to vector<8x32xf32>
    %399 = vector.extract_strided_slice %396 {offsets = [0, 32], sizes = [8, 32], strides = [1, 1]} : vector<8x128xf32> to vector<8x32xf32>
    %400 = vector.extract_strided_slice %397 {offsets = [0, 64], sizes = [8, 32], strides = [1, 1]} : vector<8x128xf32> to vector<8x32xf32>
    %401 = vector.extract_strided_slice %396 {offsets = [0, 96], sizes = [8, 32], strides = [1, 1]} : vector<8x128xf32> to vector<8x32xf32>
    %402 = arith.mulf %399, %341 : vector<8x32xf32>
    %403 = arith.mulf %398, %400 : vector<8x32xf32>
    %404 = arith.addf %402, %403 : vector<8x32xf32>
    %405 = math.tanh %404 : vector<8x32xf32>
    %406 = arith.mulf %401, %405 : vector<8x32xf32>
    %cst_81 = arith.constant dense<0.000000e+00> : vector<8xf32>
    %407 = vector.multi_reduction <add>, %406, %cst_81 [1] : vector<8x32xf32> to vector<8xf32>
    %408 = vector.shape_cast %407 : vector<8xf32> to vector<8x1xf32>
    %cst_82 = arith.constant 3.200000e+01 : f32
    %409 = vector.broadcast %cst_82 : f32 to vector<8x1xf32>
    %410 = arith.divf %408, %409 : vector<8x1xf32>
    %411 = vector.broadcast %410 : vector<8x1xf32> to vector<8x32xf32>
    %412 = arith.subf %406, %411 : vector<8x32xf32>
    %413 = arith.mulf %412, %412 : vector<8x32xf32>
    %cst_83 = arith.constant dense<0.000000e+00> : vector<8xf32>
    %414 = vector.multi_reduction <add>, %413, %cst_83 [1] : vector<8x32xf32> to vector<8xf32>
    %415 = vector.shape_cast %414 : vector<8xf32> to vector<8x1xf32>
    %cst_84 = arith.constant 3.200000e+01 : f32
    %416 = vector.broadcast %cst_84 : f32 to vector<8x1xf32>
    %417 = arith.divf %415, %416 : vector<8x1xf32>
    %418 = vector.broadcast %410 : vector<8x1xf32> to vector<8x32xf32>
    %419 = arith.subf %406, %418 : vector<8x32xf32>
    %cst_85 = arith.constant 9.99999974E-6 : f32
    %420 = vector.broadcast %cst_85 : f32 to vector<8x1xf32>
    %421 = arith.addf %417, %420 : vector<8x1xf32>
    %422 = math.rsqrt %421 : vector<8x1xf32>
    %423 = vector.broadcast %422 : vector<8x1xf32> to vector<8x32xf32>
    %424 = arith.mulf %419, %423 : vector<8x32xf32>
    %425 = vector.broadcast %4 : vector<1x32xf32> to vector<8x32xf32>
    %426 = arith.mulf %424, %425 : vector<8x32xf32>
    %427 = vector.broadcast %5 : vector<1x32xf32> to vector<8x32xf32>
    %428 = arith.addf %426, %427 : vector<8x32xf32>
    %429 = tpu.concatenate %428, %384 in 1 : vector<8x32xf32>, vector<8x32xf32> -> vector<8x64xf32>
    %cst_86 = arith.constant dense<0.000000e+00> : vector<8x128xf32>
    %430 = tpu.matmul %429, %2, %cst_86 {dimension_numbers = #tpu.dot_dimension_numbers<[1], [0], [0], [1], [0, 0, 1, 1], [], []>} : vector<8x64xf32>, vector<64x128xf32>, vector<8x128xf32> -> vector<8x128xf32>
    %431 = vector.broadcast %3 : vector<1x128xf32> to vector<8x128xf32>
    %432 = arith.addf %430, %431 : vector<8x128xf32>
    %433 = arith.negf %432 : vector<8x128xf32>
    %434 = math.exp %433 : vector<8x128xf32>
    %cst_87 = arith.constant 1.000000e+00 : f32
    %435 = vector.broadcast %cst_87 : f32 to vector<8x128xf32>
    %436 = arith.addf %435, %434 : vector<8x128xf32>
    %437 = arith.divf %435, %436 : vector<8x128xf32>
    %438 = math.tanh %432 : vector<8x128xf32>
    %439 = vector.extract_strided_slice %437 {offsets = [0, 0], sizes = [8, 32], strides = [1, 1]} : vector<8x128xf32> to vector<8x32xf32>
    %440 = vector.extract_strided_slice %437 {offsets = [0, 32], sizes = [8, 32], strides = [1, 1]} : vector<8x128xf32> to vector<8x32xf32>
    %441 = vector.extract_strided_slice %438 {offsets = [0, 64], sizes = [8, 32], strides = [1, 1]} : vector<8x128xf32> to vector<8x32xf32>
    %442 = vector.extract_strided_slice %437 {offsets = [0, 96], sizes = [8, 32], strides = [1, 1]} : vector<8x128xf32> to vector<8x32xf32>
    %443 = arith.mulf %440, %382 : vector<8x32xf32>
    %444 = arith.mulf %439, %441 : vector<8x32xf32>
    %445 = arith.addf %443, %444 : vector<8x32xf32>
    %446 = math.tanh %445 : vector<8x32xf32>
    %447 = arith.mulf %442, %446 : vector<8x32xf32>
    %c7_i32 = arith.constant 7 : i32
    %448 = arith.index_cast %c7_i32 : i32 to index
    %c0_88 = arith.constant 0 : index
    %c0_89 = arith.constant 0 : index
    %449 = vector.load %arg1[%448, %c0_88, %c0_89] : memref<8x8x32xf32, #tpu.memory_space<vmem>>, vector<1x8x32xf32>
    %450 = vector.shape_cast %449 : vector<1x8x32xf32> to vector<8x32xf32>
    %451 = tpu.concatenate %450, %406 in 1 : vector<8x32xf32>, vector<8x32xf32> -> vector<8x64xf32>
    %cst_90 = arith.constant dense<0.000000e+00> : vector<8x128xf32>
    %452 = tpu.matmul %451, %0, %cst_90 {dimension_numbers = #tpu.dot_dimension_numbers<[1], [0], [0], [1], [0, 0, 1, 1], [], []>} : vector<8x64xf32>, vector<64x128xf32>, vector<8x128xf32> -> vector<8x128xf32>
    %453 = vector.broadcast %1 : vector<1x128xf32> to vector<8x128xf32>
    %454 = arith.addf %452, %453 : vector<8x128xf32>
    %455 = arith.negf %454 : vector<8x128xf32>
    %456 = math.exp %455 : vector<8x128xf32>
    %cst_91 = arith.constant 1.000000e+00 : f32
    %457 = vector.broadcast %cst_91 : f32 to vector<8x128xf32>
    %458 = arith.addf %457, %456 : vector<8x128xf32>
    %459 = arith.divf %457, %458 : vector<8x128xf32>
    %460 = math.tanh %454 : vector<8x128xf32>
    %461 = vector.extract_strided_slice %459 {offsets = [0, 0], sizes = [8, 32], strides = [1, 1]} : vector<8x128xf32> to vector<8x32xf32>
    %462 = vector.extract_strided_slice %459 {offsets = [0, 32], sizes = [8, 32], strides = [1, 1]} : vector<8x128xf32> to vector<8x32xf32>
    %463 = vector.extract_strided_slice %460 {offsets = [0, 64], sizes = [8, 32], strides = [1, 1]} : vector<8x128xf32> to vector<8x32xf32>
    %464 = vector.extract_strided_slice %459 {offsets = [0, 96], sizes = [8, 32], strides = [1, 1]} : vector<8x128xf32> to vector<8x32xf32>
    %465 = arith.mulf %462, %404 : vector<8x32xf32>
    %466 = arith.mulf %461, %463 : vector<8x32xf32>
    %467 = arith.addf %465, %466 : vector<8x32xf32>
    %468 = math.tanh %467 : vector<8x32xf32>
    %469 = arith.mulf %464, %468 : vector<8x32xf32>
    %cst_92 = arith.constant dense<0.000000e+00> : vector<8xf32>
    %470 = vector.multi_reduction <add>, %469, %cst_92 [1] : vector<8x32xf32> to vector<8xf32>
    %471 = vector.shape_cast %470 : vector<8xf32> to vector<8x1xf32>
    %cst_93 = arith.constant 3.200000e+01 : f32
    %472 = vector.broadcast %cst_93 : f32 to vector<8x1xf32>
    %473 = arith.divf %471, %472 : vector<8x1xf32>
    %474 = vector.broadcast %473 : vector<8x1xf32> to vector<8x32xf32>
    %475 = arith.subf %469, %474 : vector<8x32xf32>
    %476 = arith.mulf %475, %475 : vector<8x32xf32>
    %cst_94 = arith.constant dense<0.000000e+00> : vector<8xf32>
    %477 = vector.multi_reduction <add>, %476, %cst_94 [1] : vector<8x32xf32> to vector<8xf32>
    %478 = vector.shape_cast %477 : vector<8xf32> to vector<8x1xf32>
    %cst_95 = arith.constant 3.200000e+01 : f32
    %479 = vector.broadcast %cst_95 : f32 to vector<8x1xf32>
    %480 = arith.divf %478, %479 : vector<8x1xf32>
    %481 = vector.broadcast %473 : vector<8x1xf32> to vector<8x32xf32>
    %482 = arith.subf %469, %481 : vector<8x32xf32>
    %cst_96 = arith.constant 9.99999974E-6 : f32
    %483 = vector.broadcast %cst_96 : f32 to vector<8x1xf32>
    %484 = arith.addf %480, %483 : vector<8x1xf32>
    %485 = math.rsqrt %484 : vector<8x1xf32>
    %486 = vector.broadcast %485 : vector<8x1xf32> to vector<8x32xf32>
    %487 = arith.mulf %482, %486 : vector<8x32xf32>
    %488 = vector.broadcast %4 : vector<1x32xf32> to vector<8x32xf32>
    %489 = arith.mulf %487, %488 : vector<8x32xf32>
    %490 = vector.broadcast %5 : vector<1x32xf32> to vector<8x32xf32>
    %491 = arith.addf %489, %490 : vector<8x32xf32>
    %492 = tpu.concatenate %491, %447 in 1 : vector<8x32xf32>, vector<8x32xf32> -> vector<8x64xf32>
    %cst_97 = arith.constant dense<0.000000e+00> : vector<8x128xf32>
    %493 = tpu.matmul %492, %2, %cst_97 {dimension_numbers = #tpu.dot_dimension_numbers<[1], [0], [0], [1], [0, 0, 1, 1], [], []>} : vector<8x64xf32>, vector<64x128xf32>, vector<8x128xf32> -> vector<8x128xf32>
    %494 = vector.broadcast %3 : vector<1x128xf32> to vector<8x128xf32>
    %495 = arith.addf %493, %494 : vector<8x128xf32>
    %496 = arith.negf %495 : vector<8x128xf32>
    %497 = math.exp %496 : vector<8x128xf32>
    %cst_98 = arith.constant 1.000000e+00 : f32
    %498 = vector.broadcast %cst_98 : f32 to vector<8x128xf32>
    %499 = arith.addf %498, %497 : vector<8x128xf32>
    %500 = arith.divf %498, %499 : vector<8x128xf32>
    %501 = math.tanh %495 : vector<8x128xf32>
    %502 = vector.extract_strided_slice %500 {offsets = [0, 0], sizes = [8, 32], strides = [1, 1]} : vector<8x128xf32> to vector<8x32xf32>
    %503 = vector.extract_strided_slice %500 {offsets = [0, 32], sizes = [8, 32], strides = [1, 1]} : vector<8x128xf32> to vector<8x32xf32>
    %504 = vector.extract_strided_slice %501 {offsets = [0, 64], sizes = [8, 32], strides = [1, 1]} : vector<8x128xf32> to vector<8x32xf32>
    %505 = vector.extract_strided_slice %500 {offsets = [0, 96], sizes = [8, 32], strides = [1, 1]} : vector<8x128xf32> to vector<8x32xf32>
    %506 = arith.mulf %503, %445 : vector<8x32xf32>
    %507 = arith.mulf %502, %504 : vector<8x32xf32>
    %508 = arith.addf %506, %507 : vector<8x32xf32>
    %509 = math.tanh %508 : vector<8x32xf32>
    %510 = arith.mulf %505, %509 : vector<8x32xf32>
    %c8_i32 = arith.constant 8 : i32
    %c0_99 = arith.constant 0 : index
    %c0_100 = arith.constant 0 : index
    %511 = vector.load %arg8[%c0_99, %c0_100] : memref<32x32xf32, #tpu.memory_space<vmem>>, vector<32x32xf32>
    %cst_101 = arith.constant dense<0.000000e+00> : vector<8x32xf32>
    %512 = tpu.matmul %510, %511, %cst_101 {dimension_numbers = #tpu.dot_dimension_numbers<[1], [0], [0], [1], [0, 0, 1, 1], [], []>} : vector<8x32xf32>, vector<32x32xf32>, vector<8x32xf32> -> vector<8x32xf32>
    %c0_102 = arith.constant 0 : index
    %c0_103 = arith.constant 0 : index
    %513 = vector.load %arg9[%c0_102, %c0_103] : memref<1x32xf32, #tpu.memory_space<vmem>>, vector<1x32xf32>
    %514 = vector.broadcast %513 : vector<1x32xf32> to vector<8x32xf32>
    %515 = arith.addf %512, %514 : vector<8x32xf32>
    %c0_104 = arith.constant 0 : index
    %c0_105 = arith.constant 0 : index
    %516 = vector.load %arg10[%c0_104, %c0_105] : memref<32x128xf32, #tpu.memory_space<vmem>>, vector<32x128xf32>
    %cst_106 = arith.constant dense<0.000000e+00> : vector<8x128xf32>
    %517 = tpu.matmul %515, %516, %cst_106 {dimension_numbers = #tpu.dot_dimension_numbers<[1], [0], [0], [1], [0, 0, 1, 1], [], []>} : vector<8x32xf32>, vector<32x128xf32>, vector<8x128xf32> -> vector<8x128xf32>
    %c0_107 = arith.constant 0 : index
    %c0_108 = arith.constant 0 : index
    %518 = vector.load %arg11[%c0_107, %c0_108] : memref<1x128xf32, #tpu.memory_space<vmem>>, vector<1x128xf32>
    %519 = vector.broadcast %518 : vector<1x128xf32> to vector<8x128xf32>
    %520 = arith.addf %517, %519 : vector<8x128xf32>
    %c0_109 = arith.constant 0 : index
    %c0_110 = arith.constant 0 : index
    %521 = vector.load %arg12[%c0_109, %c0_110] : memref<8x128xf32, #tpu.memory_space<vmem>>, vector<8x128xf32>
    tpu.vector_store %arg12[%c0_109, %c0_110], %520 {strides = array<i32>} : memref<8x128xf32, #tpu.memory_space<vmem>>, vector<8x128xf32>,
    return
  }
  func.func @transform_0(%arg0: i32) -> (i32, i32, i32) {
    %c0_i32 = arith.constant 0 : i32
    %c0_i32_0 = arith.constant 0 : i32
    %c0_i32_1 = arith.constant 0 : i32
    %c0_i32_2 = arith.constant 0 : i32
    return %c0_i32, %c0_i32_0, %c0_i32_1 : i32, i32, i32
  }
  func.func @transform_1(%arg0: i32) -> (i32, i32) {
    %c0_i32 = arith.constant 0 : i32
    %c0_i32_0 = arith.constant 0 : i32
    %c0_i32_1 = arith.constant 0 : i32
    return %c0_i32, %c0_i32_0 : i32, i32
  }
  func.func @transform_2(%arg0: i32) -> (i32, i32) {
    %c0_i32 = arith.constant 0 : i32
    %c0_i32_0 = arith.constant 0 : i32
    %c0_i32_1 = arith.constant 0 : i32
    return %c0_i32, %c0_i32_0 : i32, i32
  }
  func.func @transform_3(%arg0: i32) -> (i32, i32) {
    %c0_i32 = arith.constant 0 : i32
    %c0_i32_0 = arith.constant 0 : i32
    %c0_i32_1 = arith.constant 0 : i32
    return %c0_i32, %c0_i32_0 : i32, i32
  }
  func.func @transform_4(%arg0: i32) -> (i32, i32) {
    %c0_i32 = arith.constant 0 : i32
    %c0_i32_0 = arith.constant 0 : i32
    %c0_i32_1 = arith.constant 0 : i32
    return %c0_i32, %c0_i32_0 : i32, i32
  }
  func.func @transform_5(%arg0: i32) -> (i32, i32) {
    %c0_i32 = arith.constant 0 : i32
    %c0_i32_0 = arith.constant 0 : i32
    %c0_i32_1 = arith.constant 0 : i32
    return %c0_i32, %c0_i32_0 : i32, i32
  }
  func.func @transform_6(%arg0: i32) -> (i32, i32) {
    %c0_i32 = arith.constant 0 : i32
    %c0_i32_0 = arith.constant 0 : i32
    %c0_i32_1 = arith.constant 0 : i32
    return %c0_i32, %c0_i32_0 : i32, i32
  }
  func.func @transform_7(%arg0: i32) -> (i32, i32) {
    %c0_i32 = arith.constant 0 : i32
    %c0_i32_0 = arith.constant 0 : i32
    %c0_i32_1 = arith.constant 0 : i32
    return %c0_i32, %c0_i32_0 : i32, i32
  }
  func.func @transform_8(%arg0: i32) -> (i32, i32) {
    %c0_i32 = arith.constant 0 : i32
    %c0_i32_0 = arith.constant 0 : i32
    %c0_i32_1 = arith.constant 0 : i32
    return %c0_i32, %c0_i32_0 : i32, i32
  }
  func.func @transform_9(%arg0: i32) -> (i32, i32) {
    %c0_i32 = arith.constant 0 : i32
    %c0_i32_0 = arith.constant 0 : i32
    %c0_i32_1 = arith.constant 0 : i32
    return %c0_i32, %c0_i32_0 : i32, i32
  }
  func.func @transform_10(%arg0: i32) -> (i32, i32) {
    %c0_i32 = arith.constant 0 : i32
    %c0_i32_0 = arith.constant 0 : i32
    %c0_i32_1 = arith.constant 0 : i32
    return %c0_i32, %c0_i32_0 : i32, i32
  }
  func.func @transform_11(%arg0: i32) -> (i32, i32) {
    %c0_i32 = arith.constant 0 : i32
    %c0_i32_0 = arith.constant 0 : i32
    %c0_i32_1 = arith.constant 0 : i32
    return %c0_i32, %c0_i32_0 : i32, i32
  }
}

</mosaic_0001>

<bundles_post_ra>
// kernel: tpu_custom_call.1
= control target key start
LH: loop header
LB: loop body
LE: loop exit
PB: predicated region body
PF: predicated region fallthrough
CT: control target
= control target key end

     0   :  { %16 = vsyncpa [#allocation3], 0  ;;  %s3923_s0 = inlined_call_operand.hbm [shape: f32[8,8,32], index: 0, kind: input, shape index: {}]   ;;  %s3924_s1 = inlined_call_operand.hbm [shape: f32[64,128], index: 1, kind: input, shape index: {}]   ;;  %s3925_s2 = inlined_call_operand.vmem [shape: f32[1,128], index: 2, kind: input, shape index: {}]   ;;  %s3926_s3 = inlined_call_operand.vmem [shape: f32[1,32], index: 3, kind: input, shape index: {}]   ;;  %s3927_s4 = inlined_call_operand.hbm [shape: f32[1,32], index: 4, kind: input, shape index: {}]   ;;  %s3928_s5 = inlined_call_operand.hbm [shape: f32[64,128], index: 5, kind: input, shape index: {}]   ;;  %s3929_s6 = inlined_call_operand.hbm [shape: f32[1,128], index: 6, kind: input, shape index: {}]   ;;  %s3930_s7 = inlined_call_operand.hbm [shape: f32[32,32], index: 7, kind: input, shape index: {}]   ;;  %s3931_s8 = inlined_call_operand.hbm [shape: f32[1,32], index: 8, kind: input, shape index: {}]   ;;  %s3932_s9 = inlined_call_operand.vmem [shape: f32[32,128], index: 9, kind: input, shape index: {}]   ;;  %s3933_s10 = inlined_call_operand.vmem [shape: f32[1,128], index: 10, kind: input, shape index: {}]   ;;  %s3934_s11 = inlined_call_operand.hbm [shape: f32[8,128], index: 11, kind: output, shape index: {}]  }
   0x1   :  { %17 = vsyncpa [#allocation6], 0 }
   0x2   :  { %18 = vsyncpa [#allocation9], 0 }
   0x3   :  { %19 = vsyncpa [#allocation12], 0 }
   0x4   :  { %20 = vsyncpa [#allocation4], 0  ;;  %s3288_s17 = smov [#allocation5]   ;;  %s3289_s19 = smov [#allocation8]  }
   0x5   :  { %s38_s18 = sshll.u32 %s3288_s17, 4  ;;  %s64_s20 = sshll.u32 %s3289_s19, 4  ;;  %s39_s18 = int_to_ptr.vmem [resolvable:$true] %s38_s18  ;;  %s3364_s20 = int_to_ptr.vmem [resolvable:$true] %s64_s20 }
   0x6   :  { %s3102_s23 = scalar_lea.hbm %s3924_s1, 1024 }
   0x7   :  { %p3103_p0 = scmp.ne.s32.totalorder %s3924_s1, %s3102_s23  ;;  %p3106_p1 = scmp.lt.u32.totalorder %s3102_s23, %s3924_s1 }
   0x9   :  { %p3108_p2 = pnand %p3106_p1, %p3103_p0 }
   0xb   :  { %3111 = shalt.err (!%p3108_p2)
}
   0xc   :  { %s3112_s28 = scalar_lea.vmem %s39_s18, 1024  ;;  %p3117_p4 = scmp.lt.s32.totalorder %s39_s18, %s39_s18 }
   0xd   :  { %p3113_p3 = scmp.ne.s32.totalorder %s39_s18, %s3112_s28  ;;  %p3118_p5 = scmp.lt.s32.totalorder %s3112_s28, %s3112_s28 }
   0xf   :  { %p3119_p6 = por %p3118_p5, %p3117_p4 }
  0x11   :  { %p3120_p7 = pnand %p3119_p6, %p3113_p3 }
  0x13   :  { %3123 = shalt.err (!%p3120_p7)
}
  0x14   :  { %s3290_s29 = smov 128   ;;  %s3291_s30 = smov 8  }
  0x15   :  { %44 = dma.hbm_to_vmem [thread:$0]  %s3924_s1, 1024, %s39_s18, [#allocation6], %s3290_s29, %s3290_s29, %s3291_s30  }
  0x16   :  { %s3124_s16 = scalar_lea.hbm %s3928_s5, 1024 }
  0x17   :  { %p3125_p8 = scmp.ne.s32.totalorder %s3928_s5, %s3124_s16  ;;  %p3128_p9 = scmp.lt.u32.totalorder %s3124_s16, %s3928_s5 }
  0x19   :  { %p3130_p10 = pnand %p3128_p9, %p3125_p8 }
  0x1b   :  { %3133 = shalt.err (!%p3130_p10)
}
  0x1c   :  { %s3134_s23 = scalar_lea.vmem %s3364_s20, 1024  ;;  %p3139_p12 = scmp.lt.s32.totalorder %s3364_s20, %s3364_s20 }
  0x1d   :  { %p3135_p11 = scmp.ne.s32.totalorder %s3364_s20, %s3134_s23  ;;  %p3140_p13 = scmp.lt.s32.totalorder %s3134_s23, %s3134_s23 }
  0x1f   :  { %p3141_p0 = por %p3140_p13, %p3139_p12 }
  0x21   :  { %p3142_p1 = pnand %p3141_p0, %p3135_p11 }
  0x23   :  { %3145 = shalt.err (!%p3142_p1)
}
  0x24   :  { %70 = dma.hbm_to_vmem [thread:$0]  %s3928_s5, 1024, %s3364_s20, [#allocation9], %s3290_s29, %s3290_s29, %s3291_s30  }
  0x25   :  { %s3292_s24 = smov [#allocation11]   ;;  %s3293_s26 = smov [#allocation2]  }
  0x26   :  { %s86_s25 = sshll.u32 %s3292_s24, 4  ;;  %s26_s27 = sshll.u32 %s3293_s26, 4  ;;  %s87_s25 = int_to_ptr.vmem [resolvable:$true] %s86_s25  ;;  %s3401_s27 = int_to_ptr.vmem [resolvable:$true] %s26_s27 }
  0x27   :  { %s3146_s13 = scalar_lea.hbm %s3930_s7, 512 }
  0x28   :  { %p3147_p2 = scmp.ne.s32.totalorder %s3930_s7, %s3146_s13  ;;  %p3150_p3 = scmp.lt.u32.totalorder %s3146_s13, %s3930_s7 }
  0x2a   :  { %p3152_p4 = pnand %p3150_p3, %p3147_p2 }
  0x2c   :  { %3155 = shalt.err (!%p3152_p4)
}
  0x2d   :  { %s3156_s5 = scalar_lea.vmem %s87_s25, 512  ;;  %p3161_p6 = scmp.lt.s32.totalorder %s87_s25, %s87_s25 }
  0x2e   :  { %p3157_p5 = scmp.ne.s32.totalorder %s87_s25, %s3156_s5  ;;  %p3162_p7 = scmp.lt.s32.totalorder %s3156_s5, %s3156_s5 }
  0x30   :  { %p3163_p8 = por %p3162_p7, %p3161_p6 }
  0x32   :  { %p3164_p9 = pnand %p3163_p8, %p3157_p5 }
  0x34   :  { %3167 = shalt.err (!%p3164_p9)
}
  0x35   :  { %92 = dma.hbm_to_vmem [thread:$0]  %s3930_s7, 512, %s87_s25, [#allocation12], %s3290_s29, %s3290_s29, %s3291_s30  }
  0x36   :  { %s3168_s23 = scalar_lea.hbm %s3923_s0, 1024 }
  0x37   :  { %p3169_p10 = scmp.ne.s32.totalorder %s3923_s0, %s3168_s23  ;;  %p3172_p11 = scmp.lt.u32.totalorder %s3168_s23, %s3923_s0 }
  0x39   :  { %p3174_p12 = pnand %p3172_p11, %p3169_p10 }
  0x3b   :  { %3177 = shalt.err (!%p3174_p12)
}
  0x3c   :  { %s3178_s28 = scalar_lea.vmem %s3401_s27, 1024  ;;  %p3183_p0 = scmp.lt.s32.totalorder %s3401_s27, %s3401_s27 }
  0x3d   :  { %p3179_p13 = scmp.ne.s32.totalorder %s3401_s27, %s3178_s28  ;;  %p3184_p1 = scmp.lt.s32.totalorder %s3178_s28, %s3178_s28 }
  0x3f   :  { %p3185_p2 = por %p3184_p1, %p3183_p0 }
  0x41   :  { %p3186_p3 = pnand %p3185_p2, %p3179_p13 }
  0x43   :  { %3189 = shalt.err (!%p3186_p3)
}
  0x44   :  { %32 = dma.hbm_to_vmem [thread:$0]  %s3923_s0, 1024, %s3401_s27, [#allocation3], %s3290_s29, %s3290_s29, %s3291_s30  }
  0x45   :  { %s3294_s12 = smov [#allocation7]   ;;  %s3295_s14 = smov [#allocation10]  }
  0x46   :  { %s55_s13 = sshll.u32 %s3294_s12, 4  ;;  %s77_s15 = sshll.u32 %s3295_s14, 4  ;;  %s56_s13 = int_to_ptr.vmem [resolvable:$true] %s55_s13  ;;  %s78_s15 = int_to_ptr.vmem [resolvable:$true] %s77_s15 }
  0x47   :  { %s3190_s5 = scalar_lea.hbm %s3927_s4, 16 }
  0x48   :  { %p3191_p4 = scmp.ne.s32.totalorder %s3927_s4, %s3190_s5  ;;  %p3194_p5 = scmp.lt.u32.totalorder %s3190_s5, %s3927_s4 }
  0x4a   :  { %p3196_p6 = pnand %p3194_p5, %p3191_p4 }
  0x4c   :  { %3199 = shalt.err (!%p3196_p6)
}
  0x4d   :  { %s3200_s0 = scalar_lea.vmem %s56_s13, 16  ;;  %s3204_s29 = scalar_lea.vmem %s56_s13, 32 }
  0x4e   :  { %p3201_p7 = scmp.ne.s32.totalorder %s56_s13, %s3200_s0  ;;  %p3205_p8 = scmp.lt.s32.totalorder %s56_s13, %s56_s13 }
  0x4f   :  { %p3206_p9 = scmp.lt.s32.totalorder %s3204_s29, %s3200_s0 }
  0x51   :  { %p3207_p10 = por %p3206_p9, %p3205_p8 }
  0x53   :  { %p3208_p11 = pnand %p3207_p10, %p3201_p7 }
  0x55   :  { %3211 = shalt.err (!%p3208_p11)
}
  0x56   :  { %58 = dma.hbm_to_vmem [thread:$0]  %s3927_s4, 16, %s56_s13, [#allocation6]  }
  0x57   :  { %s3212_s18 = scalar_lea.hbm %s3929_s6, 16 }
  0x58   :  { %p3213_p12 = scmp.ne.s32.totalorder %s3929_s6, %s3212_s18  ;;  %p3216_p13 = scmp.lt.u32.totalorder %s3212_s18, %s3929_s6 }
  0x5a   :  { %p3218_p0 = pnand %p3216_p13, %p3213_p12 }
  0x5c   :  { %3221 = shalt.err (!%p3218_p0)
}
  0x5d   :  { %s3222_s25 = scalar_lea.vmem %s78_s15, 16  ;;  %s3226_s12 = scalar_lea.vmem %s78_s15, 32 }
  0x5e   :  { %p3223_p1 = scmp.ne.s32.totalorder %s78_s15, %s3222_s25  ;;  %p3227_p2 = scmp.lt.s32.totalorder %s78_s15, %s78_s15 }
  0x5f   :  { %p3228_p3 = scmp.lt.s32.totalorder %s3226_s12, %s3222_s25 }
  0x61   :  { %p3229_p4 = por %p3228_p3, %p3227_p2 }
  0x63   :  { %p3230_p5 = pnand %p3229_p4, %p3223_p1 }
  0x65   :  { %3233 = shalt.err (!%p3230_p5)
}
  0x66   :  { %80 = dma.hbm_to_vmem [thread:$0]  %s3929_s6, 16, %s78_s15, [#allocation9]  }
  0x67   :  { %s3296_s14 = smov [#allocation13]   ;;  %s3234_s20 = scalar_lea.hbm %s3931_s8, 16 }
  0x68   :  { %s99_s16 = sshll.u32 %s3296_s14, 4  ;;  %p3235_p6 = scmp.ne.s32.totalorder %s3931_s8, %s3234_s20  ;;  %s100_s16 = int_to_ptr.vmem [resolvable:$true] %s99_s16 }
  0x69   :  { %p3238_p7 = scmp.lt.u32.totalorder %s3234_s20, %s3931_s8 }
  0x6b   :  { %p3240_p8 = pnand %p3238_p7, %p3235_p6 }
  0x6d   :  { %3243 = shalt.err (!%p3240_p8)
}
  0x6e   :  { %s3244_s29 = scalar_lea.vmem %s100_s16, 16  ;;  %s3248_s6 = scalar_lea.vmem %s100_s16, 32 }
  0x6f   :  { %p3245_p9 = scmp.ne.s32.totalorder %s100_s16, %s3244_s29  ;;  %p3249_p10 = scmp.lt.s32.totalorder %s100_s16, %s100_s16 }
  0x70   :  { %p3250_p11 = scmp.lt.s32.totalorder %s3248_s6, %s3244_s29 }
  0x72   :  { %p3251_p12 = por %p3250_p11, %p3249_p10 }
  0x74   :  { %p3252_p13 = pnand %p3251_p12, %p3245_p9 }
  0x76   :  { %3255 = shalt.err (!%p3252_p13)
}
  0x77   :  { %102 = dma.hbm_to_vmem [thread:$0]  %s3931_s8, 16, %s100_s16, [#allocation12]  }
  0x78   :  { %3278 = dma.done.wait [#allocation3], 1024  }
  0x79   :  { %3279 = vsyncadd [#allocation3], 4294966272 }
  0x7a   :  { %3280 = dma.done.wait [#allocation6], 1040  }
  0x7b   :  { %3281 = vsyncadd [#allocation6], 4294966256 }
  0x7c   :  { %3282 = dma.done.wait [#allocation9], 1040  }
  0x7d   :  { %3283 = vsyncadd [#allocation9], 4294966256 }
  0x7e   :  { %3284 = dma.done.wait [#allocation12], 528  }
  0x7f   :  { %3285 = vsyncadd [#allocation12], 4294966768  ;;  %v3297_v0 = vmov 0.0|0.0   ;;  %vm3298_vm0 = vmmov 0   ;;  %v3299_v1 = vmov 0.0   ;;  %v128_v2 = vld [vmem:[#allocation5] sm:$0xff] }
  0x80   :  { %2736 = vmatprep.subr.bf16.mxu0 %v3297_v0  ;;  %2426 = vmatprep.mubr.msk.f32.mxu0 %vm3298_vm0, %v3299_v1  ;;  %v129_v3 = vld [vmem:[#allocation5 + $0x8] sm:$0xff]  ;;  %v130_v4 = vld [vmem:[#allocation5 + $0x10] sm:$0xff]  ;;  %v131_v6 = vld [vmem:[#allocation5 + $0x18] sm:$0xff]  ;;  %vm149_vm1 = vcmask 261120   ;;  %vm157_vm2 = vcmask 523264   ;;  %s3300_s23 = smov 64  }
  0x81   :  { %2748 = vmatprep.subr.bf16.mxu1 %v3297_v0  ;;  %2445 = vmatprep.mubr.msk.f32.mxu1 %vm3298_vm0, %v3299_v1  ;;  %v3480_v5 = vpack.c.bf16 %v129_v3, %v128_v2  ;;  %v3483_v7 = vpack.c.bf16 %v131_v6, %v130_v4  ;;  %v132_v8 = vld [vmem:[#allocation5 + $0x20] sm:$0xff]  ;;  %v133_v9 = vld [vmem:[#allocation5 + $0x28] sm:$0xff]  ;;  %v134_v11 = vld [vmem:[#allocation5 + $0x30] sm:$0xff]  ;;  %s3301_s1 = smov 32   ;;  %s3302_s26 = smov 96  }
  0x82   :  { %v3487_v10 = vpack.c.bf16 %v133_v9, %v132_v8  ;;  %v135_v12 = vld [vmem:[#allocation5 + $0x38] sm:$0xff]  ;;  %v148_v14 = vld [vmem:[#allocation2] sm:$0xff]  ;;  %v404_v33 = vld [vmem:[#allocation2 + $0x8] sm:$0xff]  ;;  %s3303_s20 = smov [#allocation14]  }
  0x83   :  { %2738 = vmatpush3.bf16.msra.mxu0 %v3480_v5  ;;  %v3491_v13 = vpack.c.bf16 %v135_v12, %v134_v11  ;;  %v150_v15 = vsel %vm149_vm1, %v148_v14, 0.0  ;;  %v3511_v16 = vld [vmem:[%s3925_s2] ss:$0 sm:$0xff]  ;;  %v137_v57 = vld [vmem:[#allocation8] sm:$0xff]  ;;  %v138_v58 = vld [vmem:[#allocation8 + $0x8] sm:$0xff]  ;;  %s2204_s19 = sshll.u32 %s3303_s20, 4  ;;  %s2205_s19 = int_to_ptr.vmem [resolvable:$true] %s2204_s19 }
  0x84   :  { %2739 = vmatprep.subr.bf16.mxu0 %v3297_v0  ;;  %v2219_v38 = vld [vmem:[%s3926_s3] ss:$0 sm:$0xff]  ;;  %v139_v59 = vld [vmem:[#allocation8 + $0x10] sm:$0xff]  ;;  %v3545_v60 = vpack.c.bf16 %v138_v58, %v137_v57  ;;  %v141_v63 = vld [vmem:[#allocation8 + $0x20] sm:$0xff]  ;;  %p3261_p1 = scmp.lt.s32.totalorder %s2205_s19, %s2205_s19 }
  0x85   :  { %v2220_v49 = vld [vmem:[#allocation7] ss:$0 sm:$0xff]  ;;  %v142_v2 = vld [vmem:[#allocation8 + $0x28] sm:$0xff]  ;;  %v143_v4 = vld [vmem:[#allocation8 + $0x30] sm:$0xff] }
  0x86   :  { %v140_v61 = vld [vmem:[#allocation8 + $0x18] sm:$0xff]  ;;  %2750 = vmatpush3.bf16.msra.mxu1 %v3545_v60  ;;  %v3552_v3 = vpack.c.bf16 %v142_v2, %v141_v63 }
  0x87   :  { %2741 = vmatpush3.bf16.msra.mxu0 %v3483_v7  ;;  %v3548_v62 = vpack.c.bf16 %v140_v61, %v139_v59  ;;  %2751 = vmatprep.subr.bf16.mxu1 %v3297_v0  ;;  %v144_v6 = vld [vmem:[#allocation8 + $0x38] sm:$0xff] }
  0x88   :  { %2742 = vmatprep.subr.bf16.mxu0 %v3297_v0  ;;  %v3556_v8 = vpack.c.bf16 %v144_v6, %v143_v4 }
  0x8a   :  { %2753 = vmatpush3.bf16.msra.mxu1 %v3548_v62 }
  0x8b   :  { %2744 = vmatpush3.bf16.msra.mxu0 %v3487_v10  ;;  %2754 = vmatprep.subr.bf16.mxu1 %v3297_v0 }
  0x8c   :  { %2745 = vmatprep.subr.bf16.mxu0 %v3297_v0 }
  0x8e   :  { %2756 = vmatpush3.bf16.msra.mxu1 %v3552_v3 }
  0x8f   :  { %2747 = vmatpush3.bf16.msra.mxu0 %v3491_v13  ;;  %2757 = vmatprep.subr.bf16.mxu1 %v3297_v0 }
  0x90   :  { %2760 = vmatprep.subr.bf16.mxu0 %v3297_v0 }
  0x92   :  { %2427 = vmatmul.mubr.msk.f32.vlgmr.msra.gmra.mrb[0].mxu0 %vm157_vm2, %v150_v15  ;;  %2759 = vmatpush3.bf16.msra.mxu1 %v3556_v8 }
  0x93   :  { %2762 = vmatpush3.bf16.msra.mxu0 %v3480_v5  ;;  %2464 = vmatprep.mubr.msk.f32.mxu0 %vm3298_vm0, %v3299_v1 }
  0x94   :  { %2763 = vmatprep.subr.bf16.mxu0 %v3297_v0  ;;  %2772 = vmatprep.subr.bf16.mxu1 %v3297_v0 }
  0x97   :  { %2765 = vmatpush3.bf16.msra.mxu0 %v3483_v7 }
  0x98   :  { %2766 = vmatprep.subr.bf16.mxu0 %v3297_v0 }
  0x9b   :  { %2768 = vmatpush3.bf16.msra.mxu0 %v3487_v10 }
  0x9c   :  { %2769 = vmatprep.subr.bf16.mxu0 %v3297_v0 }
  0x9f   :  { %2771 = vmatpush3.bf16.msra.mxu0 %v3491_v13 }
  0xa0   :  { %2784 = vmatprep.subr.bf16.mxu0 %v3297_v0 }
 0x165   :  { %v227_v17 = vpop.f32.mrb[0].mxu0 }
 0x166   :  { %v228_v18 = vadd.f32 %v3511_v16, %v227_v17  ;;  %v2428_v19 = vpop.f32.mrb[1].mxu0 }
 0x168   :  { %2956 = vtanh.f32 %v228_v18  ;;  %v2218_v21 = vmul.f32 -1.442695, %v228_v18 }
 0x16a   :  { %2958 = vpow2.f32 %v2218_v21 }
 0x172   :  { %v2957_v20 = vpop.eup %2956 }
 0x173   :  { %240 = vrot.lane.b32.xlu0 %v2957_v20, %s3300_s23 }
 0x174   :  { %v2959_v22 = vpop.eup %2958 }
 0x175   :  { %v234_v23 = vadd.f32 1.0, %v2959_v22 }
 0x177   :  { %2960 = vrcp.f32 %v234_v23 }
 0x181   :  { %v2961_v24 = vpop.eup %2960 }
 0x182   :  { %v238_v27 = vmul.f32 0.0, %v2961_v24 }
 0x1e5   :  { %v241_v25 = vpop.permute.xlu0 %240 }
 0x1e6   :  { %v243_v26 = vmul.f32 %v2961_v24, %v241_v25 }
 0x1e8   :  { %245 = vrot.lane.b32.xlu0 %v243_v26, %s3301_s1 }
 0x25a   :  { %v246_v28 = vpop.permute.xlu0 %245 }
 0x25b   :  { %v3516_v29 = vadd.f32 %v246_v28, %v238_v27  ;;  %v636_v28 = vld [vmem:[#allocation2 + $0x10] sm:$0xff] }
 0x25d   :  { %2962 = vtanh.f32 %v3516_v29 }
 0x267   :  { %v2963_v30 = vpop.eup %2962 }
 0x268   :  { %251 = vrot.lane.b32.xlu1 %v2963_v30, %s3300_s23 }
 0x2da   :  { %v252_v31 = vpop.permute.xlu1 %251 }
 0x2db   :  { %v254_v32 = vmul.f32 %v2961_v24, %v252_v31 }
 0x2dd   :  { %405 = vrot.lane.b32.xlu0 %v254_v32, %s3300_s23  ;;  %256 = vrot.lane.b32.xlu1 %v254_v32, %s3301_s1 }
 0x34f   :  { %v406_v34 = vpop.permute.xlu0 %405  ;;  %v257_v35 = vpop.permute.xlu1 %256 }
 0x350   :  { %v408_v36 = vsel %vm149_vm1, %v404_v33, %v406_v34  ;;  %v259_v37 = vsel %vm149_vm1, %v257_v35, 0.0  ;;  %v3598_v33 = vld [vmem:[#allocation10] ss:$0 sm:$0xff] }
 0x351   :  { %2465 = vmatmul.mubr.msk.f32.vlgmr.msra.gmra.mrb[2].mxu0 %vm157_vm2, %v408_v36  ;;  %260 = vadd.xlane.f32.xlu1 %v259_v37 }
 0x352   :  { %2786 = vmatpush3.bf16.msra.mxu0 %v3480_v5  ;;  %2502 = vmatprep.mubr.msk.f32.mxu0 %vm3298_vm0, %v3299_v1 }
 0x353   :  { %2787 = vmatprep.subr.bf16.mxu0 %v3297_v0 }
 0x356   :  { %2789 = vmatpush3.bf16.msra.mxu0 %v3483_v7 }
 0x357   :  { %2790 = vmatprep.subr.bf16.mxu0 %v3297_v0 }
 0x35a   :  { %2792 = vmatpush3.bf16.msra.mxu0 %v3487_v10 }
 0x35b   :  { %2793 = vmatprep.subr.bf16.mxu0 %v3297_v0 }
 0x35e   :  { %2795 = vmatpush3.bf16.msra.mxu0 %v3491_v13 }
 0x35f   :  { %2808 = vmatprep.subr.bf16.mxu0 %v3297_v0 }
 0x362   :  { %282 = vrot.lane.b32.xlu1 %v2219_v38, %s3302_s26 }
 0x3de   :  { %v261_v39 = vpop.xlane.xlu1 %260 }
 0x3df   :  { %v263_v40 = vmul.f32 0.03125, %v261_v39 }
 0x3e1   :  { %v264_v41 = vsub.f32 %v254_v32, %v263_v40 }
 0x3e2   :  { %v3542_v53 = vpop.permute.xlu1 %282 }
 0x3e3   :  { %v265_v42 = vmul.f32 %v264_v41, %v264_v41 }
 0x3e5   :  { %267 = vrot.lane.b32.xlu0 %v265_v42, %s3301_s1 }
 0x424   :  { %v478_v43 = vpop.f32.mrb[2].mxu0 }
 0x425   :  { %v479_v44 = vadd.f32 %v3511_v16, %v478_v43  ;;  %v2466_v45 = vpop.f32.mrb[3].mxu0 }
 0x427   :  { %2964 = vtanh.f32 %v479_v44  ;;  %v2225_v50 = vmul.f32 -1.442695, %v479_v44 }
 0x429   :  { %2966 = vpow2.f32 %v2225_v50 }
 0x431   :  { %v2965_v46 = vpop.eup %2964 }
 0x432   :  { %491 = vrot.lane.b32.xlu1 %v2965_v46, %s3300_s23 }
 0x433   :  { %v2967_v51 = vpop.eup %2966 }
 0x434   :  { %v485_v52 = vadd.f32 1.0, %v2967_v51 }
 0x436   :  { %2968 = vrcp.f32 %v485_v52 }
 0x440   :  { %v2969_v54 = vpop.eup %2968 }
 0x441   :  { %v489_v20 = vmul.f32 %v2969_v54, %v3516_v29 }
 0x457   :  { %v268_v47 = vpop.permute.xlu0 %267 }
 0x458   :  { %v270_v48 = vsel %vm149_vm1, %v268_v47, 0.0 }
 0x459   :  { %271 = vadd.xlane.f32.xlu0 %v270_v48 }
 0x46f   :  { %291 = vrot.lane.b32.xlu0 %v2220_v49, %s3302_s26 }
 0x4a4   :  { %v492_v55 = vpop.permute.xlu1 %491 }
 0x4a5   :  { %v494_v56 = vmul.f32 %v2969_v54, %v492_v55 }
 0x4a7   :  { %496 = vrot.lane.b32.xlu0 %v494_v56, %s3301_s1 }
 0x4e6   :  { %v272_v9 = vpop.xlane.xlu0 %271 }
 0x4e7   :  { %v273_v11 = vmul.f32 0.03125, %v272_v9 }
 0x4e9   :  { %v274_v12 = vadd.f32 1e-05, %v273_v11 }
 0x4ea   :  { %v3561_v17 = vpop.permute.xlu0 %291 }
 0x4eb   :  { %2970 = vrsqrt.f32 %v274_v12 }
 0x4f5   :  { %v2971_v14 = vpop.eup %2970 }
 0x4f6   :  { %v276_v15 = vmul.f32 %v2971_v14, %v264_v41 }
 0x4f8   :  { %v285_v18 = vmul.f32 %v3542_v53, %v276_v15 }
 0x4fa   :  { %v294_v19 = vadd.f32 %v3561_v17, %v285_v18 }
 0x4fc   :  { %296 = vrot.lane.b32.xlu1 %v294_v19, %s3301_s1 }
 0x519   :  { %v497_v21 = vpop.permute.xlu0 %496 }
 0x51a   :  { %v3567_v22 = vadd.f32 %v497_v21, %v489_v20 }
 0x51c   :  { %2972 = vtanh.f32 %v3567_v22 }
 0x526   :  { %v2973_v23 = vpop.eup %2972 }
 0x527   :  { %502 = vrot.lane.b32.xlu1 %v2973_v23, %s3300_s23 }
 0x56e   :  { %v297_v24 = vpop.permute.xlu1 %296 }
 0x56f   :  { %v299_v25 = vsel %vm149_vm1, %v297_v24, 0.0 }
 0x570   :  { %2446 = vmatmul.mubr.msk.f32.vlgmr.msra.gmra.mrb[0].mxu1 %vm157_vm2, %v299_v25 }
 0x571   :  { %2774 = vmatpush3.bf16.msra.mxu1 %v3545_v60  ;;  %2483 = vmatprep.mubr.msk.f32.mxu1 %vm3298_vm0, %v3299_v1 }
 0x572   :  { %2775 = vmatprep.subr.bf16.mxu1 %v3297_v0 }
 0x575   :  { %2777 = vmatpush3.bf16.msra.mxu1 %v3548_v62 }
 0x576   :  { %2778 = vmatprep.subr.bf16.mxu1 %v3297_v0 }
 0x579   :  { %2780 = vmatpush3.bf16.msra.mxu1 %v3552_v3 }
 0x57a   :  { %2781 = vmatprep.subr.bf16.mxu1 %v3297_v0 }
 0x57d   :  { %2783 = vmatpush3.bf16.msra.mxu1 %v3556_v8 }
 0x57e   :  { %2796 = vmatprep.subr.bf16.mxu1 %v3297_v0 }
 0x599   :  { %v503_v26 = vpop.permute.xlu1 %502 }
 0x59a   :  { %v505_v27 = vmul.f32 %v2969_v54, %v503_v26 }
 0x59c   :  { %637 = vrot.lane.b32.xlu1 %v505_v27, %s3300_s23  ;;  %507 = vrot.lane.b32.xlu0 %v505_v27, %s3301_s1 }
 0x60e   :  { %v638_v29 = vpop.permute.xlu1 %637  ;;  %v508_v30 = vpop.permute.xlu0 %507 }
 0x60f   :  { %v640_v31 = vsel %vm149_vm1, %v636_v28, %v638_v29  ;;  %v510_v32 = vsel %vm149_vm1, %v508_v30, 0.0 }
 0x610   :  { %2503 = vmatmul.mubr.msk.f32.vlgmr.msra.gmra.mrb[4].mxu0 %vm157_vm2, %v640_v31  ;;  %511 = vadd.xlane.f32.xlu0 %v510_v32 }
 0x611   :  { %2810 = vmatpush3.bf16.msra.mxu0 %v3480_v5  ;;  %2540 = vmatprep.mubr.msk.f32.mxu0 %vm3298_vm0, %v3299_v1 }
 0x612   :  { %2811 = vmatprep.subr.bf16.mxu0 %v3297_v0 }
 0x615   :  { %2813 = vmatpush3.bf16.msra.mxu0 %v3483_v7 }
 0x616   :  { %2814 = vmatprep.subr.bf16.mxu0 %v3297_v0 }
 0x619   :  { %2816 = vmatpush3.bf16.msra.mxu0 %v3487_v10 }
 0x61a   :  { %2817 = vmatprep.subr.bf16.mxu0 %v3297_v0 }
 0x61d   :  { %2819 = vmatpush3.bf16.msra.mxu0 %v3491_v13 }
 0x61e   :  { %2832 = vmatprep.subr.bf16.mxu0 %v3297_v0 }
 0x643   :  { %v375_v34 = vpop.f32.mrb[0].mxu1 }
 0x644   :  { %v376_v35 = vadd.f32 %v3598_v33, %v375_v34  ;;  %v2447_v36 = vpop.f32.mrb[1].mxu1 }
 0x645   :  { %v868_v36 = vld [vmem:[#allocation2 + $0x18] sm:$0xff] }
 0x646   :  { %2974 = vtanh.f32 %v376_v35  ;;  %v2223_v42 = vmul.f32 -1.442695, %v376_v35 }
 0x648   :  { %2976 = vpow2.f32 %v2223_v42 }
 0x650   :  { %v2975_v37 = vpop.eup %2974 }
 0x651   :  { %388 = vrot.lane.b32.xlu1 %v2975_v37, %s3300_s23 }
 0x652   :  { %v2977_v43 = vpop.eup %2976 }
 0x653   :  { %v382_v44 = vadd.f32 1.0, %v2977_v43 }
 0x655   :  { %2978 = vrcp.f32 %v382_v44 }
 0x65f   :  { %v2979_v45 = vpop.eup %2978 }
 0x660   :  { %v386_v55 = vmul.f32 0.0, %v2979_v45 }
 0x69d   :  { %v512_v38 = vpop.xlane.xlu0 %511 }
 0x69e   :  { %v513_v39 = vmul.f32 0.03125, %v512_v38 }
 0x6a0   :  { %v514_v40 = vsub.f32 %v505_v27, %v513_v39 }
 0x6a2   :  { %v515_v41 = vmul.f32 %v514_v40, %v514_v40 }
 0x6a4   :  { %517 = vrot.lane.b32.xlu1 %v515_v41, %s3301_s1 }
 0x6c3   :  { %v389_v46 = vpop.permute.xlu1 %388 }
 0x6c4   :  { %v391_v47 = vmul.f32 %v2979_v45, %v389_v46 }
 0x6c6   :  { %393 = vrot.lane.b32.xlu1 %v391_v47, %s3301_s1 }
 0x6e3   :  { %v710_v48 = vpop.f32.mrb[4].mxu0 }
 0x6e4   :  { %v2504_v49 = vpop.f32.mrb[5].mxu0  ;;  %v711_v52 = vadd.f32 %v3511_v16, %v710_v48 }
 0x6e6   :  { %2980 = vtanh.f32 %v711_v52  ;;  %v2229_v59 = vmul.f32 -1.442695, %v711_v52 }
 0x6f0   :  { %v2981_v54 = vpop.eup %2980 }
 0x716   :  { %v518_v50 = vpop.permute.xlu1 %517 }
 0x717   :  { %v520_v51 = vsel %vm149_vm1, %v518_v50, 0.0 }
 0x718   :  { %521 = vadd.xlane.f32.xlu1 %v520_v51 }
 0x729   :  { %723 = vrot.lane.b32.xlu1 %v2981_v54, %s3300_s23 }
 0x738   :  { %v394_v56 = vpop.permute.xlu1 %393 }
 0x739   :  { %v3607_v57 = vadd.f32 %v394_v56, %v386_v55 }
 0x73b   :  { %2982 = vtanh.f32 %v3607_v57 }
 0x73c   :  { %2984 = vpow2.f32 %v2229_v59 }
 0x745   :  { %v2983_v58 = vpop.eup %2982 }
 0x746   :  { %399 = vrot.lane.b32.xlu0 %v2983_v58, %s3300_s23  ;;  %v2985_v4 = vpop.eup %2984 }
 0x747   :  { %v717_v6 = vadd.f32 1.0, %v2985_v4 }
 0x7a5   :  { %v522_v61 = vpop.xlane.xlu1 %521 }
 0x7a6   :  { %v523_v63 = vmul.f32 0.03125, %v522_v61 }
 0x7a8   :  { %v524_v2 = vadd.f32 1e-05, %v523_v63 }
 0x7a9   :  { %v724_v19 = vpop.permute.xlu1 %723 }
 0x7aa   :  { %2986 = vrsqrt.f32 %v524_v2 }
 0x7ab   :  { %2988 = vrcp.f32 %v717_v6 }
 0x7b4   :  { %v2987_v9 = vpop.eup %2986 }
 0x7b5   :  { %v526_v11 = vmul.f32 %v2987_v9, %v514_v40  ;;  %v2989_v20 = vpop.eup %2988 }
 0x7b6   :  { %v726_v21 = vmul.f32 %v2989_v20, %v724_v19  ;;  %v721_v26 = vmul.f32 %v2989_v20, %v3567_v22 }
 0x7b7   :  { %v527_v12 = vmul.f32 %v526_v11, %v3542_v53 }
 0x7b8   :  { %v400_v15 = vpop.permute.xlu0 %399 }
 0x7b9   :  { %v528_v14 = vadd.f32 %v527_v12, %v3561_v17  ;;  %v402_v18 = vmul.f32 %v2979_v45, %v400_v15 }
 0x7bb   :  { %530 = vrot.lane.b32.xlu0 %v528_v14, %s3301_s1 }
 0x7bf   :  { %534 = vrot.lane.b32.xlu0 %v402_v18, %s3300_s23 }
 0x7c3   :  { %728 = vrot.lane.b32.xlu0 %v726_v21, %s3301_s1 }
 0x82d   :  { %v531_v23 = vpop.permute.xlu0 %530 }
 0x831   :  { %v535_v24 = vpop.permute.xlu0 %534 }
 0x832   :  { %v537_v25 = vsel %vm149_vm1, %v531_v23, %v535_v24 }
 0x833   :  { %2484 = vmatmul.mubr.msk.f32.vlgmr.msra.gmra.mrb[2].mxu1 %vm157_vm2, %v537_v25 }
 0x834   :  { %2798 = vmatpush3.bf16.msra.mxu1 %v3545_v60  ;;  %2521 = vmatprep.mubr.msk.f32.mxu1 %vm3298_vm0, %v3299_v1 }
 0x835   :  { %v729_v27 = vpop.permute.xlu0 %728  ;;  %2799 = vmatprep.subr.bf16.mxu1 %v3297_v0 }
 0x836   :  { %v3623_v28 = vadd.f32 %v729_v27, %v721_v26 }
 0x838   :  { %2990 = vtanh.f32 %v3623_v28  ;;  %2801 = vmatpush3.bf16.msra.mxu1 %v3548_v62 }
 0x839   :  { %2802 = vmatprep.subr.bf16.mxu1 %v3297_v0 }
 0x83c   :  { %2804 = vmatpush3.bf16.msra.mxu1 %v3552_v3 }
 0x83d   :  { %2805 = vmatprep.subr.bf16.mxu1 %v3297_v0 }
 0x840   :  { %2807 = vmatpush3.bf16.msra.mxu1 %v3556_v8 }
 0x841   :  { %2820 = vmatprep.subr.bf16.mxu1 %v3297_v0 }
 0x842   :  { %v2991_v22 = vpop.eup %2990 }
 0x843   :  { %734 = vrot.lane.b32.xlu0 %v2991_v22, %s3300_s23 }
 0x8b5   :  { %v735_v29 = vpop.permute.xlu0 %734 }
 0x8b6   :  { %v737_v30 = vmul.f32 %v2989_v20, %v735_v29 }
 0x8b8   :  { %869 = vrot.lane.b32.xlu0 %v737_v30, %s3300_s23  ;;  %739 = vrot.lane.b32.xlu1 %v737_v30, %s3301_s1 }
 0x906   :  { %v607_v31 = vpop.f32.mrb[2].mxu1 }
 0x907   :  { %v608_v32 = vadd.f32 %v3598_v33, %v607_v31  ;;  %v2485_v34 = vpop.f32.mrb[3].mxu1 }
 0x909   :  { %2992 = vtanh.f32 %v608_v32  ;;  %v2227_v41 = vmul.f32 -1.442695, %v608_v32 }
 0x90b   :  { %2994 = vpow2.f32 %v2227_v41 }
 0x913   :  { %v2993_v35 = vpop.eup %2992 }
 0x914   :  { %620 = vrot.lane.b32.xlu0 %v2993_v35, %s3300_s23 }
 0x915   :  { %v2995_v42 = vpop.eup %2994 }
 0x916   :  { %v614_v43 = vadd.f32 1.0, %v2995_v42 }
 0x918   :  { %2996 = vrcp.f32 %v614_v43 }
 0x922   :  { %v2997_v49 = vpop.eup %2996 }
 0x923   :  { %v618_v56 = vmul.f32 %v2997_v49, %v3607_v57 }
 0x92a   :  { %v870_v37 = vpop.permute.xlu0 %869  ;;  %v740_v38 = vpop.permute.xlu1 %739 }
 0x92b   :  { %v872_v39 = vsel %vm149_vm1, %v868_v36, %v870_v37  ;;  %v742_v40 = vsel %vm149_vm1, %v740_v38, 0.0 }
 0x92c   :  { %2541 = vmatmul.mubr.msk.f32.vlgmr.msra.gmra.mrb[6].mxu0 %vm157_vm2, %v872_v39  ;;  %743 = vadd.xlane.f32.xlu1 %v742_v40  ;;  %v1100_v39 = vld [vmem:[#allocation2 + $0x20] sm:$0xff] }
 0x92d   :  { %2834 = vmatpush3.bf16.msra.mxu0 %v3480_v5  ;;  %2578 = vmatprep.mubr.msk.f32.mxu0 %vm3298_vm0, %v3299_v1 }
 0x92e   :  { %2835 = vmatprep.subr.bf16.mxu0 %v3297_v0 }
 0x931   :  { %2837 = vmatpush3.bf16.msra.mxu0 %v3483_v7 }
 0x932   :  { %2838 = vmatprep.subr.bf16.mxu0 %v3297_v0 }
 0x935   :  { %2840 = vmatpush3.bf16.msra.mxu0 %v3487_v10 }
 0x936   :  { %2841 = vmatprep.subr.bf16.mxu0 %v3297_v0 }
 0x939   :  { %2843 = vmatpush3.bf16.msra.mxu0 %v3491_v13 }
 0x93a   :  { %2856 = vmatprep.subr.bf16.mxu0 %v3297_v0 }
 0x986   :  { %v621_v48 = vpop.permute.xlu0 %620 }
 0x987   :  { %v623_v50 = vmul.f32 %v2997_v49, %v621_v48 }
 0x9b9   :  { %v744_v44 = vpop.xlane.xlu1 %743 }
 0x9ba   :  { %v745_v45 = vmul.f32 0.03125, %v744_v44 }
 0x9bc   :  { %v746_v46 = vsub.f32 %v737_v30, %v745_v45 }
 0x9be   :  { %v747_v47 = vmul.f32 %v746_v46, %v746_v46 }
 0x9c0   :  { %749 = vrot.lane.b32.xlu0 %v747_v47, %s3301_s1 }
 0x9c4   :  { %625 = vrot.lane.b32.xlu0 %v623_v50, %s3301_s1 }
 0x9ff   :  { %v942_v51 = vpop.f32.mrb[6].mxu0 }
 0xa00   :  { %v2542_v52 = vpop.f32.mrb[7].mxu0  ;;  %v943_v61 = vadd.f32 %v3511_v16, %v942_v51 }
 0xa02   :  { %v2233_v4 = vmul.f32 -1.442695, %v943_v61 }
 0xa32   :  { %v750_v54 = vpop.permute.xlu0 %749 }
 0xa33   :  { %v752_v55 = vsel %vm149_vm1, %v750_v54, 0.0 }
 0xa34   :  { %753 = vadd.xlane.f32.xlu0 %v752_v55 }
 0xa36   :  { %v626_v58 = vpop.permute.xlu0 %625 }
 0xa37   :  { %v3654_v59 = vadd.f32 %v626_v58, %v618_v56 }
 0xa39   :  { %2998 = vtanh.f32 %v3654_v59 }
 0xa3a   :  { %3000 = vtanh.f32 %v943_v61 }
 0xa3b   :  { %3002 = vpow2.f32 %v2233_v4 }
 0xa43   :  { %v2999_v63 = vpop.eup %2998 }
 0xa44   :  { %631 = vrot.lane.b32.xlu1 %v2999_v63, %s3300_s23  ;;  %v3001_v2 = vpop.eup %3000 }
 0xa45   :  { %v3003_v57 = vpop.eup %3002 }
 0xa46   :  { %v949_v12 = vadd.f32 1.0, %v3003_v57 }
 0xa4a   :  { %955 = vrot.lane.b32.xlu0 %v3001_v2, %s3300_s23 }
 0xab6   :  { %v632_v20 = vpop.permute.xlu1 %631 }
 0xab7   :  { %v634_v21 = vmul.f32 %v2997_v49, %v632_v20 }
 0xac1   :  { %v754_v6 = vpop.xlane.xlu0 %753 }
 0xac2   :  { %v755_v9 = vmul.f32 0.03125, %v754_v6 }
 0xac4   :  { %v756_v11 = vadd.f32 1e-05, %v755_v9 }
 0xac5   :  { %v956_v23 = vpop.permute.xlu0 %955 }
 0xac6   :  { %3004 = vrsqrt.f32 %v756_v11 }
 0xac7   :  { %3006 = vrcp.f32 %v949_v12 }
 0xad0   :  { %v3005_v14 = vpop.eup %3004 }
 0xad1   :  { %v758_v15 = vmul.f32 %v3005_v14, %v746_v46  ;;  %v3007_v24 = vpop.eup %3006 }
 0xad2   :  { %v958_v25 = vmul.f32 %v3007_v24, %v956_v23  ;;  %v953_v29 = vmul.f32 %v3007_v24, %v3623_v28 }
 0xad3   :  { %v759_v18 = vmul.f32 %v758_v15, %v3542_v53 }
 0xad5   :  { %v760_v19 = vadd.f32 %v759_v18, %v3561_v17 }
 0xad7   :  { %762 = vrot.lane.b32.xlu1 %v760_v19, %s3301_s1 }
 0xadb   :  { %766 = vrot.lane.b32.xlu1 %v634_v21, %s3300_s23 }
 0xadf   :  { %960 = vrot.lane.b32.xlu1 %v958_v25, %s3301_s1 }
 0xb49   :  { %v763_v26 = vpop.permute.xlu1 %762 }
 0xb4d   :  { %v767_v27 = vpop.permute.xlu1 %766 }
 0xb4e   :  { %v769_v22 = vsel %vm149_vm1, %v763_v26, %v767_v27 }
 0xb4f   :  { %2522 = vmatmul.mubr.msk.f32.vlgmr.msra.gmra.mrb[4].mxu1 %vm157_vm2, %v769_v22 }
 0xb50   :  { %2822 = vmatpush3.bf16.msra.mxu1 %v3545_v60  ;;  %2559 = vmatprep.mubr.msk.f32.mxu1 %vm3298_vm0, %v3299_v1 }
 0xb51   :  { %v961_v30 = vpop.permute.xlu1 %960  ;;  %2823 = vmatprep.subr.bf16.mxu1 %v3297_v0 }
 0xb52   :  { %v3672_v31 = vadd.f32 %v961_v30, %v953_v29 }
 0xb54   :  { %3008 = vtanh.f32 %v3672_v31  ;;  %2825 = vmatpush3.bf16.msra.mxu1 %v3548_v62 }
 0xb55   :  { %2826 = vmatprep.subr.bf16.mxu1 %v3297_v0 }
 0xb58   :  { %2828 = vmatpush3.bf16.msra.mxu1 %v3552_v3 }
 0xb59   :  { %2829 = vmatprep.subr.bf16.mxu1 %v3297_v0 }
 0xb5c   :  { %2831 = vmatpush3.bf16.msra.mxu1 %v3556_v8 }
 0xb5d   :  { %2844 = vmatprep.subr.bf16.mxu1 %v3297_v0 }
 0xb5e   :  { %v3009_v28 = vpop.eup %3008 }
 0xb5f   :  { %966 = vrot.lane.b32.xlu1 %v3009_v28, %s3300_s23 }
 0xbd1   :  { %v967_v32 = vpop.permute.xlu1 %966 }
 0xbd2   :  { %v969_v34 = vmul.f32 %v3007_v24, %v967_v32 }
 0xbd4   :  { %1101 = vrot.lane.b32.xlu1 %v969_v34, %s3300_s23  ;;  %971 = vrot.lane.b32.xlu0 %v969_v34, %s3301_s1 }
 0xc22   :  { %v839_v35 = vpop.f32.mrb[4].mxu1 }
 0xc23   :  { %v840_v36 = vadd.f32 %v3598_v33, %v839_v35  ;;  %v2523_v37 = vpop.f32.mrb[5].mxu1 }
 0xc25   :  { %3010 = vtanh.f32 %v840_v36  ;;  %v2231_v44 = vmul.f32 -1.442695, %v840_v36 }
 0xc27   :  { %3012 = vpow2.f32 %v2231_v44 }
 0xc2f   :  { %v3011_v38 = vpop.eup %3010 }
 0xc30   :  { %852 = vrot.lane.b32.xlu1 %v3011_v38, %s3300_s23 }
 0xc31   :  { %v3013_v45 = vpop.eup %3012 }
 0xc32   :  { %v846_v46 = vadd.f32 1.0, %v3013_v45 }
 0xc34   :  { %3014 = vrcp.f32 %v846_v46 }
 0xc3e   :  { %v3015_v52 = vpop.eup %3014 }
 0xc3f   :  { %v850_v63 = vmul.f32 %v3015_v52, %v3654_v59 }
 0xc46   :  { %v1102_v40 = vpop.permute.xlu1 %1101  ;;  %v972_v41 = vpop.permute.xlu0 %971 }
 0xc47   :  { %v1104_v42 = vsel %vm149_vm1, %v1100_v39, %v1102_v40  ;;  %v974_v43 = vsel %vm149_vm1, %v972_v41, 0.0 }
 0xc48   :  { %2579 = vmatmul.mubr.msk.f32.vlgmr.msra.gmra.mrb[8].mxu0 %vm157_vm2, %v1104_v42  ;;  %975 = vadd.xlane.f32.xlu0 %v974_v43  ;;  %v1332_v42 = vld [vmem:[#allocation2 + $0x28] sm:$0xff] }
 0xc49   :  { %2858 = vmatpush3.bf16.msra.mxu0 %v3480_v5  ;;  %2616 = vmatprep.mubr.msk.f32.mxu0 %vm3298_vm0, %v3299_v1 }
 0xc4a   :  { %2859 = vmatprep.subr.bf16.mxu0 %v3297_v0 }
 0xc4d   :  { %2861 = vmatpush3.bf16.msra.mxu0 %v3483_v7 }
 0xc4e   :  { %2862 = vmatprep.subr.bf16.mxu0 %v3297_v0 }
 0xc51   :  { %2864 = vmatpush3.bf16.msra.mxu0 %v3487_v10 }
 0xc52   :  { %2865 = vmatprep.subr.bf16.mxu0 %v3297_v0 }
 0xc55   :  { %2867 = vmatpush3.bf16.msra.mxu0 %v3491_v13 }
 0xc56   :  { %2880 = vmatprep.subr.bf16.mxu0 %v3297_v0 }
 0xca2   :  { %v853_v51 = vpop.permute.xlu1 %852 }
 0xca3   :  { %v855_v54 = vmul.f32 %v3015_v52, %v853_v51 }
 0xcd5   :  { %v976_v47 = vpop.xlane.xlu0 %975 }
 0xcd6   :  { %v977_v48 = vmul.f32 0.03125, %v976_v47 }
 0xcd8   :  { %v978_v49 = vsub.f32 %v969_v34, %v977_v48 }
 0xcda   :  { %v979_v50 = vmul.f32 %v978_v49, %v978_v49 }
 0xcdc   :  { %981 = vrot.lane.b32.xlu1 %v979_v50, %s3301_s1 }
 0xce0   :  { %857 = vrot.lane.b32.xlu1 %v855_v54, %s3301_s1 }
 0xd1b   :  { %v1174_v55 = vpop.f32.mrb[8].mxu0 }
 0xd1c   :  { %v2580_v56 = vpop.f32.mrb[9].mxu0  ;;  %v1175_v2 = vadd.f32 %v3511_v16, %v1174_v55 }
 0xd1e   :  { %v2237_v57 = vmul.f32 -1.442695, %v1175_v2 }
 0xd4e   :  { %v982_v58 = vpop.permute.xlu1 %981 }
 0xd4f   :  { %v984_v61 = vsel %vm149_vm1, %v982_v58, 0.0 }
 0xd50   :  { %985 = vadd.xlane.f32.xlu1 %v984_v61 }
 0xd52   :  { %v858_v4 = vpop.permute.xlu1 %857 }
 0xd53   :  { %v3704_v6 = vadd.f32 %v858_v4, %v850_v63 }
 0xd55   :  { %3016 = vtanh.f32 %v3704_v6 }
 0xd56   :  { %3018 = vtanh.f32 %v1175_v2 }
 0xd57   :  { %3020 = vpow2.f32 %v2237_v57 }
 0xd5f   :  { %v3017_v9 = vpop.eup %3016 }
 0xd60   :  { %v3019_v11 = vpop.eup %3018  ;;  %863 = vrot.lane.b32.xlu0 %v3017_v9, %s3300_s23 }
 0xd61   :  { %1187 = vrot.lane.b32.xlu1 %v3019_v11, %s3300_s23  ;;  %v3021_v59 = vpop.eup %3020 }
 0xd62   :  { %v1181_v18 = vadd.f32 1.0, %v3021_v59 }
 0xdd2   :  { %v864_v24 = vpop.permute.xlu0 %863 }
 0xdd3   :  { %v866_v25 = vmul.f32 %v3015_v52, %v864_v24 }
 0xddd   :  { %v986_v12 = vpop.xlane.xlu1 %985 }
 0xdde   :  { %v987_v14 = vmul.f32 0.03125, %v986_v12 }
 0xde0   :  { %v988_v15 = vadd.f32 1e-05, %v987_v14 }
 0xde1   :  { %v1188_v26 = vpop.permute.xlu1 %1187 }
 0xde2   :  { %3022 = vrsqrt.f32 %v988_v15 }
 0xde3   :  { %3024 = vrcp.f32 %v1181_v18 }
 0xdec   :  { %v3023_v19 = vpop.eup %3022 }
 0xded   :  { %v990_v20 = vmul.f32 %v3023_v19, %v978_v49  ;;  %v3025_v27 = vpop.eup %3024 }
 0xdee   :  { %v1190_v22 = vmul.f32 %v3025_v27, %v1188_v26  ;;  %v1185_v32 = vmul.f32 %v3025_v27, %v3672_v31 }
 0xdef   :  { %v991_v21 = vmul.f32 %v990_v20, %v3542_v53 }
 0xdf1   :  { %v992_v23 = vadd.f32 %v991_v21, %v3561_v17 }
 0xdf3   :  { %994 = vrot.lane.b32.xlu0 %v992_v23, %s3301_s1 }
 0xdf7   :  { %998 = vrot.lane.b32.xlu0 %v866_v25, %s3300_s23 }
 0xdfb   :  { %1192 = vrot.lane.b32.xlu0 %v1190_v22, %s3301_s1 }
 0xe65   :  { %v995_v29 = vpop.permute.xlu0 %994 }
 0xe69   :  { %v999_v30 = vpop.permute.xlu0 %998 }
 0xe6a   :  { %v1001_v28 = vsel %vm149_vm1, %v995_v29, %v999_v30 }
 0xe6b   :  { %2560 = vmatmul.mubr.msk.f32.vlgmr.msra.gmra.mrb[6].mxu1 %vm157_vm2, %v1001_v28 }
 0xe6c   :  { %2846 = vmatpush3.bf16.msra.mxu1 %v3545_v60  ;;  %2597 = vmatprep.mubr.msk.f32.mxu1 %vm3298_vm0, %v3299_v1 }
 0xe6d   :  { %v1193_v34 = vpop.permute.xlu0 %1192  ;;  %2847 = vmatprep.subr.bf16.mxu1 %v3297_v0 }
 0xe6e   :  { %v3721_v35 = vadd.f32 %v1193_v34, %v1185_v32 }
 0xe70   :  { %3026 = vtanh.f32 %v3721_v35  ;;  %2849 = vmatpush3.bf16.msra.mxu1 %v3548_v62 }
 0xe71   :  { %2850 = vmatprep.subr.bf16.mxu1 %v3297_v0 }
 0xe74   :  { %2852 = vmatpush3.bf16.msra.mxu1 %v3552_v3 }
 0xe75   :  { %2853 = vmatprep.subr.bf16.mxu1 %v3297_v0 }
 0xe78   :  { %2855 = vmatpush3.bf16.msra.mxu1 %v3556_v8 }
 0xe79   :  { %2868 = vmatprep.subr.bf16.mxu1 %v3297_v0 }
 0xe7a   :  { %v3027_v31 = vpop.eup %3026 }
 0xe7b   :  { %1198 = vrot.lane.b32.xlu0 %v3027_v31, %s3300_s23 }
 0xeed   :  { %v1199_v36 = vpop.permute.xlu0 %1198 }
 0xeee   :  { %v1201_v37 = vmul.f32 %v3025_v27, %v1199_v36 }
 0xef0   :  { %1333 = vrot.lane.b32.xlu0 %v1201_v37, %s3300_s23  ;;  %1203 = vrot.lane.b32.xlu1 %v1201_v37, %s3301_s1 }
 0xf3e   :  { %v1071_v38 = vpop.f32.mrb[6].mxu1 }
 0xf3f   :  { %v1072_v39 = vadd.f32 %v3598_v33, %v1071_v38  ;;  %v2561_v40 = vpop.f32.mrb[7].mxu1 }
 0xf41   :  { %3028 = vtanh.f32 %v1072_v39  ;;  %v2235_v47 = vmul.f32 -1.442695, %v1072_v39 }
 0xf43   :  { %3030 = vpow2.f32 %v2235_v47 }
 0xf4b   :  { %v3029_v41 = vpop.eup %3028 }
 0xf4c   :  { %1084 = vrot.lane.b32.xlu0 %v3029_v41, %s3300_s23 }
 0xf4d   :  { %v3031_v48 = vpop.eup %3030 }
 0xf4e   :  { %v1078_v49 = vadd.f32 1.0, %v3031_v48 }
 0xf50   :  { %3032 = vrcp.f32 %v1078_v49 }
 0xf5a   :  { %v3033_v56 = vpop.eup %3032 }
 0xf5b   :  { %v1082_v9 = vmul.f32 %v3033_v56, %v3704_v6 }
 0xf62   :  { %v1334_v43 = vpop.permute.xlu0 %1333  ;;  %v1204_v44 = vpop.permute.xlu1 %1203 }
 0xf63   :  { %v1336_v45 = vsel %vm149_vm1, %v1332_v42, %v1334_v43  ;;  %v1206_v46 = vsel %vm149_vm1, %v1204_v44, 0.0  ;;  %v1564_v44 = vld [vmem:[#allocation2 + $0x30] sm:$0xff] }
 0xf64   :  { %2617 = vmatmul.mubr.msk.f32.vlgmr.msra.gmra.mrb[10].mxu0 %vm157_vm2, %v1336_v45  ;;  %1207 = vadd.xlane.f32.xlu1 %v1206_v46 }
 0xf65   :  { %2882 = vmatpush3.bf16.msra.mxu0 %v3480_v5  ;;  %2654 = vmatprep.mubr.msk.f32.mxu0 %vm3298_vm0, %v3299_v1 }
 0xf66   :  { %2883 = vmatprep.subr.bf16.mxu0 %v3297_v0 }
 0xf69   :  { %2885 = vmatpush3.bf16.msra.mxu0 %v3483_v7 }
 0xf6a   :  { %2886 = vmatprep.subr.bf16.mxu0 %v3297_v0 }
 0xf6d   :  { %2888 = vmatpush3.bf16.msra.mxu0 %v3487_v10 }
 0xf6e   :  { %2889 = vmatprep.subr.bf16.mxu0 %v3297_v0 }
 0xf71   :  { %2891 = vmatpush3.bf16.msra.mxu0 %v3491_v13 }
 0xf72   :  { %2904 = vmatprep.subr.bf16.mxu0 %v3297_v0 }
 0xfbe   :  { %v1085_v55 = vpop.permute.xlu0 %1084 }
 0xfbf   :  { %v1087_v58 = vmul.f32 %v3033_v56, %v1085_v55 }
 0xff1   :  { %v1208_v50 = vpop.xlane.xlu1 %1207 }
 0xff2   :  { %v1209_v51 = vmul.f32 0.03125, %v1208_v50 }
 0xff4   :  { %v1210_v52 = vsub.f32 %v1201_v37, %v1209_v51 }
 0xff6   :  { %v1211_v54 = vmul.f32 %v1210_v52, %v1210_v52 }
 0xff8   :  { %1213 = vrot.lane.b32.xlu0 %v1211_v54, %s3301_s1 }
 0xffc   :  { %1089 = vrot.lane.b32.xlu0 %v1087_v58, %s3301_s1 }
0x1037   :  { %v1406_v61 = vpop.f32.mrb[10].mxu0 }
0x1038   :  { %v2618_v63 = vpop.f32.mrb[11].mxu0  ;;  %v1407_v12 = vadd.f32 %v3511_v16, %v1406_v61 }
0x103a   :  { %v2241_v59 = vmul.f32 -1.442695, %v1407_v12 }
0x106a   :  { %v1214_v2 = vpop.permute.xlu0 %1213 }
0x106b   :  { %v1216_v4 = vsel %vm149_vm1, %v1214_v2, 0.0 }
0x106c   :  { %1217 = vadd.xlane.f32.xlu0 %v1216_v4  ;;  %v3804_v4 = vld [vmem:[%s3925_s2] ss:$0 sm:$0xff] }
0x106e   :  { %v1090_v11 = vpop.permute.xlu0 %1089 }
0x106f   :  { %v3752_v57 = vadd.f32 %v1090_v11, %v1082_v9 }
0x1071   :  { %3034 = vtanh.f32 %v3752_v57 }
0x1072   :  { %3036 = vtanh.f32 %v1407_v12 }
0x1073   :  { %3038 = vpow2.f32 %v2241_v59 }
0x107b   :  { %v3035_v14 = vpop.eup %3034 }
0x107c   :  { %1095 = vrot.lane.b32.xlu1 %v3035_v14, %s3300_s23  ;;  %v3037_v15 = vpop.eup %3036 }
0x107d   :  { %v3039_v6 = vpop.eup %3038 }
0x107e   :  { %v1413_v21 = vadd.f32 1.0, %v3039_v6 }
0x1082   :  { %1419 = vrot.lane.b32.xlu0 %v3037_v15, %s3300_s23 }
0x10ee   :  { %v1096_v26 = vpop.permute.xlu1 %1095 }
0x10ef   :  { %v1098_v27 = vmul.f32 %v3033_v56, %v1096_v26 }
0x10f9   :  { %v1218_v18 = vpop.xlane.xlu0 %1217 }
0x10fa   :  { %v1219_v19 = vmul.f32 0.03125, %v1218_v18 }
0x10fc   :  { %v1220_v20 = vadd.f32 1e-05, %v1219_v19 }
0x10fd   :  { %v1420_v22 = vpop.permute.xlu0 %1419 }
0x10fe   :  { %3040 = vrsqrt.f32 %v1220_v20 }
0x10ff   :  { %3042 = vrcp.f32 %v1413_v21 }
0x1108   :  { %v3041_v23 = vpop.eup %3040 }
0x1109   :  { %v1222_v24 = vmul.f32 %v3041_v23, %v1210_v52  ;;  %v3043_v29 = vpop.eup %3042 }
0x110a   :  { %v1422_v30 = vmul.f32 %v3043_v29, %v1420_v22  ;;  %v1417_v31 = vmul.f32 %v3043_v29, %v3721_v35 }
0x110b   :  { %v1223_v16 = vmul.f32 %v1222_v24, %v3542_v53 }
0x110d   :  { %v1224_v25 = vadd.f32 %v1223_v16, %v3561_v17 }
0x110f   :  { %1226 = vrot.lane.b32.xlu1 %v1224_v25, %s3301_s1 }
0x1113   :  { %1230 = vrot.lane.b32.xlu1 %v1098_v27, %s3300_s23 }
0x1117   :  { %1424 = vrot.lane.b32.xlu1 %v1422_v30, %s3301_s1 }
0x1181   :  { %v1227_v28 = vpop.permute.xlu1 %1226 }
0x1185   :  { %v1231_v32 = vpop.permute.xlu1 %1230 }
0x1186   :  { %v1233_v34 = vsel %vm149_vm1, %v1227_v28, %v1231_v32 }
0x1187   :  { %2598 = vmatmul.mubr.msk.f32.vlgmr.msra.gmra.mrb[8].mxu1 %vm157_vm2, %v1233_v34 }
0x1188   :  { %2870 = vmatpush3.bf16.msra.mxu1 %v3545_v60  ;;  %2635 = vmatprep.mubr.msk.f32.mxu1 %vm3298_vm0, %v3299_v1 }
0x1189   :  { %v1425_v36 = vpop.permute.xlu1 %1424  ;;  %2871 = vmatprep.subr.bf16.mxu1 %v3297_v0 }
0x118a   :  { %v3770_v37 = vadd.f32 %v1425_v36, %v1417_v31 }
0x118c   :  { %3044 = vtanh.f32 %v3770_v37  ;;  %2873 = vmatpush3.bf16.msra.mxu1 %v3548_v62 }
0x118d   :  { %2874 = vmatprep.subr.bf16.mxu1 %v3297_v0 }
0x1190   :  { %2876 = vmatpush3.bf16.msra.mxu1 %v3552_v3 }
0x1191   :  { %2877 = vmatprep.subr.bf16.mxu1 %v3297_v0 }
0x1194   :  { %2879 = vmatpush3.bf16.msra.mxu1 %v3556_v8 }
0x1195   :  { %2892 = vmatprep.subr.bf16.mxu1 %v3297_v0 }
0x1196   :  { %v3045_v35 = vpop.eup %3044 }
0x1197   :  { %1430 = vrot.lane.b32.xlu1 %v3045_v35, %s3300_s23 }
0x1209   :  { %v1431_v38 = vpop.permute.xlu1 %1430 }
0x120a   :  { %v1433_v39 = vmul.f32 %v3043_v29, %v1431_v38 }
0x120c   :  { %1565 = vrot.lane.b32.xlu1 %v1433_v39, %s3300_s23  ;;  %1435 = vrot.lane.b32.xlu0 %v1433_v39, %s3301_s1 }
0x125a   :  { %v1303_v40 = vpop.f32.mrb[8].mxu1 }
0x125b   :  { %v1304_v41 = vadd.f32 %v3598_v33, %v1303_v40  ;;  %v2599_v42 = vpop.f32.mrb[9].mxu1 }
0x125d   :  { %3046 = vtanh.f32 %v1304_v41  ;;  %v2239_v49 = vmul.f32 -1.442695, %v1304_v41 }
0x125f   :  { %3048 = vpow2.f32 %v2239_v49 }
0x1267   :  { %v3047_v43 = vpop.eup %3046 }
0x1268   :  { %1316 = vrot.lane.b32.xlu1 %v3047_v43, %s3300_s23  ;;  %v1796_v43 = vld [vmem:[#allocation2 + $0x38] sm:$0xff] }
0x127e   :  { %v1566_v45 = vpop.permute.xlu1 %1565  ;;  %v1436_v46 = vpop.permute.xlu0 %1435 }
0x127f   :  { %v1568_v47 = vsel %vm149_vm1, %v1564_v44, %v1566_v45  ;;  %v1438_v48 = vsel %vm149_vm1, %v1436_v46, 0.0 }
0x1280   :  { %2655 = vmatmul.mubr.msk.f32.vlgmr.msra.gmra.mrb[12].mxu0 %vm157_vm2, %v1568_v47  ;;  %1439 = vadd.xlane.f32.xlu0 %v1438_v48 }
0x1281   :  { %2906 = vmatpush3.bf16.msra.mxu0 %v3480_v5  ;;  %2692 = vmatprep.mubr.msk.f32.mxu0 %vm3298_vm0, %v3299_v1  ;;  %v3049_v5 = vpop.eup %3048 }
0x1282   :  { %2907 = vmatprep.subr.bf16.mxu0 %v3297_v0  ;;  %v1310_v50 = vadd.f32 1.0, %v3049_v5 }
0x1284   :  { %3050 = vrcp.f32 %v1310_v50 }
0x1285   :  { %2909 = vmatpush3.bf16.msra.mxu0 %v3483_v7 }
0x1286   :  { %2910 = vmatprep.subr.bf16.mxu0 %v3297_v0 }
0x1289   :  { %2912 = vmatpush3.bf16.msra.mxu0 %v3487_v10 }
0x128a   :  { %2913 = vmatprep.subr.bf16.mxu0 %v3297_v0 }
0x128d   :  { %2915 = vmatpush3.bf16.msra.mxu0 %v3491_v13 }
0x128e   :  { %2928 = vmatprep.subr.bf16.mxu0 %v3297_v0  ;;  %v3051_v56 = vpop.eup %3050 }
0x128f   :  { %v1314_v2 = vmul.f32 %v3051_v56, %v3752_v57 }
0x12da   :  { %v1317_v7 = vpop.permute.xlu1 %1316 }
0x12db   :  { %v1319_v10 = vmul.f32 %v3051_v56, %v1317_v7 }
0x130d   :  { %v1440_v51 = vpop.xlane.xlu0 %1439 }
0x130e   :  { %v1441_v52 = vmul.f32 0.03125, %v1440_v51 }
0x1310   :  { %v1442_v54 = vsub.f32 %v1433_v39, %v1441_v52 }
0x1312   :  { %v1443_v55 = vmul.f32 %v1442_v54, %v1442_v54 }
0x1314   :  { %1445 = vrot.lane.b32.xlu1 %v1443_v55, %s3301_s1 }
0x1318   :  { %1321 = vrot.lane.b32.xlu1 %v1319_v10, %s3301_s1 }
0x1353   :  { %v1638_v58 = vpop.f32.mrb[12].mxu0 }
0x1354   :  { %v2656_v13 = vpop.f32.mrb[13].mxu0  ;;  %v1639_v9 = vadd.f32 %v3804_v4, %v1638_v58 }
0x1356   :  { %v2245_v57 = vmul.f32 -1.442695, %v1639_v9 }
0x1386   :  { %v1446_v61 = vpop.permute.xlu1 %1445 }
0x1387   :  { %v1448_v63 = vsel %vm149_vm1, %v1446_v61, 0.0 }
0x1388   :  { %1449 = vadd.xlane.f32.xlu1 %v1448_v63 }
0x138a   :  { %v1322_v11 = vpop.permute.xlu1 %1321 }
0x138b   :  { %v3807_v12 = vadd.f32 %v1322_v11, %v1314_v2 }
0x138d   :  { %3052 = vtanh.f32 %v3807_v12 }
0x138e   :  { %3054 = vtanh.f32 %v1639_v9 }
0x138f   :  { %3056 = vpow2.f32 %v2245_v57 }
0x1397   :  { %v3053_v14 = vpop.eup %3052 }
0x1398   :  { %v3055_v15 = vpop.eup %3054  ;;  %1327 = vrot.lane.b32.xlu0 %v3053_v14, %s3300_s23 }
0x1399   :  { %1651 = vrot.lane.b32.xlu1 %v3055_v15, %s3300_s23  ;;  %v3057_v20 = vpop.eup %3056 }
0x139a   :  { %v1645_v6 = vadd.f32 1.0, %v3057_v20 }
0x140a   :  { %v1328_v25 = vpop.permute.xlu0 %1327 }
0x140b   :  { %v1330_v26 = vmul.f32 %v3051_v56, %v1328_v25 }
0x1415   :  { %v1450_v59 = vpop.xlane.xlu1 %1449 }
0x1416   :  { %v1451_v18 = vmul.f32 0.03125, %v1450_v59 }
0x1418   :  { %v1452_v19 = vadd.f32 1e-05, %v1451_v18 }
0x1419   :  { %v1652_v27 = vpop.permute.xlu1 %1651 }
0x141a   :  { %3058 = vrsqrt.f32 %v1452_v19 }
0x141b   :  { %3060 = vrcp.f32 %v1645_v6 }
0x1424   :  { %v3059_v21 = vpop.eup %3058 }
0x1425   :  { %v1454_v23 = vmul.f32 %v3059_v21, %v1442_v54  ;;  %v3061_v22 = vpop.eup %3060 }
0x1426   :  { %v1654_v29 = vmul.f32 %v3061_v22, %v1652_v27  ;;  %v1649_v34 = vmul.f32 %v3061_v22, %v3770_v37 }
0x1427   :  { %v1455_v24 = vmul.f32 %v1454_v23, %v3542_v53 }
0x1429   :  { %v1456_v16 = vadd.f32 %v1455_v24, %v3561_v17 }
0x142b   :  { %1458 = vrot.lane.b32.xlu0 %v1456_v16, %s3301_s1 }
0x142f   :  { %1462 = vrot.lane.b32.xlu0 %v1330_v26, %s3300_s23 }
0x1433   :  { %1656 = vrot.lane.b32.xlu0 %v1654_v29, %s3301_s1 }
0x149d   :  { %v1459_v30 = vpop.permute.xlu0 %1458 }
0x14a1   :  { %v1463_v28 = vpop.permute.xlu0 %1462 }
0x14a2   :  { %v1465_v32 = vsel %vm149_vm1, %v1459_v30, %v1463_v28 }
0x14a3   :  { %2636 = vmatmul.mubr.msk.f32.vlgmr.msra.gmra.mrb[10].mxu1 %vm157_vm2, %v1465_v32 }
0x14a4   :  { %2894 = vmatpush3.bf16.msra.mxu1 %v3545_v60  ;;  %2673 = vmatprep.mubr.msk.f32.mxu1 %vm3298_vm0, %v3299_v1 }
0x14a5   :  { %v1657_v31 = vpop.permute.xlu0 %1656  ;;  %2895 = vmatprep.subr.bf16.mxu1 %v3297_v0 }
0x14a6   :  { %v3824_v36 = vadd.f32 %v1657_v31, %v1649_v34 }
0x14a8   :  { %3062 = vtanh.f32 %v3824_v36  ;;  %2897 = vmatpush3.bf16.msra.mxu1 %v3548_v62 }
0x14a9   :  { %2898 = vmatprep.subr.bf16.mxu1 %v3297_v0 }
0x14ac   :  { %2900 = vmatpush3.bf16.msra.mxu1 %v3552_v3 }
0x14ad   :  { %2901 = vmatprep.subr.bf16.mxu1 %v3297_v0 }
0x14b0   :  { %2903 = vmatpush3.bf16.msra.mxu1 %v3556_v8 }
0x14b1   :  { %2916 = vmatprep.subr.bf16.mxu1 %v3297_v0 }
0x14b2   :  { %v3063_v37 = vpop.eup %3062 }
0x14b3   :  { %1662 = vrot.lane.b32.xlu0 %v3063_v37, %s3300_s23  ;;  %v3101_v37 = vld [vmem:[#allocation10] ss:$0 sm:$0xff] }
0x1525   :  { %v1663_v35 = vpop.permute.xlu0 %1662 }
0x1526   :  { %v1665_v38 = vmul.f32 %v3061_v22, %v1663_v35 }
0x1528   :  { %1797 = vrot.lane.b32.xlu0 %v1665_v38, %s3300_s23  ;;  %1667 = vrot.lane.b32.xlu1 %v1665_v38, %s3301_s1 }
0x1576   :  { %v1535_v39 = vpop.f32.mrb[10].mxu1 }
0x1577   :  { %v1536_v40 = vadd.f32 %v3598_v33, %v1535_v39  ;;  %v2637_v41 = vpop.f32.mrb[11].mxu1 }
0x1579   :  { %3064 = vtanh.f32 %v1536_v40  ;;  %v2243_v48 = vmul.f32 -1.442695, %v1536_v40 }
0x157b   :  { %3066 = vpow2.f32 %v2243_v48 }
0x1583   :  { %v3065_v42 = vpop.eup %3064 }
0x1584   :  { %1548 = vrot.lane.b32.xlu0 %v3065_v42, %s3300_s23 }
0x1585   :  { %v3067_v33 = vpop.eup %3066 }
0x1586   :  { %v1542_v49 = vadd.f32 1.0, %v3067_v33 }
0x1588   :  { %3068 = vrcp.f32 %v1542_v49 }
0x1592   :  { %v3069_v55 = vpop.eup %3068 }
0x1593   :  { %v1546_v61 = vmul.f32 %v3069_v55, %v3807_v12 }
0x159a   :  { %v1798_v44 = vpop.permute.xlu0 %1797  ;;  %v1668_v45 = vpop.permute.xlu1 %1667 }
0x159b   :  { %v1800_v46 = vsel %vm149_vm1, %v1796_v43, %v1798_v44  ;;  %v1670_v47 = vsel %vm149_vm1, %v1668_v45, 0.0 }
0x159c   :  { %2693 = vmatmul.mubr.msk.f32.vlgmr.msra.gmra.mrb[14].mxu0 %vm157_vm2, %v1800_v46  ;;  %1671 = vadd.xlane.f32.xlu1 %v1670_v47 }
0x159d   :  { %2722 = vmatprep.mubr.msk.f32.mxu0 %vm3298_vm0, %v3299_v1 }
0x15f6   :  { %v1549_v54 = vpop.permute.xlu0 %1548 }
0x15f7   :  { %v1551_v7 = vmul.f32 %v3069_v55, %v1549_v54 }
0x1629   :  { %v1672_v5 = vpop.xlane.xlu1 %1671 }
0x162a   :  { %v1673_v50 = vmul.f32 0.03125, %v1672_v5 }
0x162c   :  { %v1674_v51 = vsub.f32 %v1665_v38, %v1673_v50 }
0x162e   :  { %v1675_v52 = vmul.f32 %v1674_v51, %v1674_v51 }
0x1630   :  { %1677 = vrot.lane.b32.xlu0 %v1675_v52, %s3301_s1 }
0x1634   :  { %1553 = vrot.lane.b32.xlu0 %v1551_v7, %s3301_s1 }
0x166f   :  { %v1870_v56 = vpop.f32.mrb[14].mxu0 }
0x1670   :  { %v2694_v10 = vpop.f32.mrb[15].mxu0  ;;  %v1871_v9 = vadd.f32 %v3804_v4, %v1870_v56 }
0x1672   :  { %v2249_v15 = vmul.f32 -1.442695, %v1871_v9 }
0x16a2   :  { %v1678_v58 = vpop.permute.xlu0 %1677 }
0x16a3   :  { %v1680_v13 = vsel %vm149_vm1, %v1678_v58, 0.0 }
0x16a4   :  { %1681 = vadd.xlane.f32.xlu0 %v1680_v13 }
0x16a6   :  { %v1554_v63 = vpop.permute.xlu0 %1553 }
0x16a7   :  { %v3847_v2 = vadd.f32 %v1554_v63, %v1546_v61 }
0x16a9   :  { %3070 = vtanh.f32 %v3847_v2 }
0x16aa   :  { %3072 = vtanh.f32 %v1871_v9 }
0x16ab   :  { %3074 = vpow2.f32 %v2249_v15 }
0x16b3   :  { %v3071_v11 = vpop.eup %3070 }
0x16b4   :  { %1559 = vrot.lane.b32.xlu1 %v3071_v11, %s3300_s23  ;;  %v3073_v14 = vpop.eup %3072 }
0x16b5   :  { %v3075_v12 = vpop.eup %3074 }
0x16b6   :  { %v1877_v19 = vadd.f32 1.0, %v3075_v12 }
0x16ba   :  { %1883 = vrot.lane.b32.xlu0 %v3073_v14, %s3300_s23 }
0x1726   :  { %v1560_v23 = vpop.permute.xlu1 %1559 }
0x1727   :  { %v1562_v24 = vmul.f32 %v3069_v55, %v1560_v23  ;;  %v2028_v23 = vld [vmem:[#allocation11 + $0x8] sm:$0xff] }
0x1731   :  { %v1682_v57 = vpop.xlane.xlu0 %1681 }
0x1732   :  { %v1683_v59 = vmul.f32 0.03125, %v1682_v57 }
0x1734   :  { %v1684_v18 = vadd.f32 1e-05, %v1683_v59 }
0x1735   :  { %v1884_v16 = vpop.permute.xlu0 %1883 }
0x1736   :  { %3076 = vrsqrt.f32 %v1684_v18 }
0x1737   :  { %3078 = vrcp.f32 %v1877_v19 }
0x1740   :  { %v3077_v20 = vpop.eup %3076 }
0x1741   :  { %v1686_v6 = vmul.f32 %v3077_v20, %v1674_v51  ;;  %v3079_v25 = vpop.eup %3078 }
0x1742   :  { %v1886_v26 = vmul.f32 %v3079_v25, %v1884_v16  ;;  %v1881_v30 = vmul.f32 %v3079_v25, %v3824_v36 }
0x1743   :  { %v1687_v4 = vmul.f32 %v1686_v6, %v3542_v53 }
0x1745   :  { %v1688_v21 = vadd.f32 %v1687_v4, %v3561_v17 }
0x1747   :  { %1690 = vrot.lane.b32.xlu1 %v1688_v21, %s3301_s1  ;;  %v2027_v21 = vld [vmem:[#allocation11] sm:$0xff] }
0x1748   :  { %v2929_v16 = vpack.c.bf16 %v2028_v23, %v2027_v21 }
0x174a   :  { %2930 = vmatpush3.bf16.msra.mxu0 %v2929_v16 }
0x174b   :  { %1694 = vrot.lane.b32.xlu1 %v1562_v24, %s3300_s23  ;;  %v2029_v24 = vld [vmem:[#allocation11 + $0x10] sm:$0xff]  ;;  %2931 = vmatprep.subr.bf16.mxu0 %v3297_v0 }
0x174f   :  { %1888 = vrot.lane.b32.xlu1 %v1886_v26, %s3301_s1 }
0x17b9   :  { %v1691_v27 = vpop.permute.xlu1 %1690 }
0x17bd   :  { %v1695_v22 = vpop.permute.xlu1 %1694 }
0x17be   :  { %v1697_v29 = vsel %vm149_vm1, %v1691_v27, %v1695_v22  ;;  %v2113_v22 = vld [vmem:[%s3932_s9] sm:$0xff] }
0x17bf   :  { %2674 = vmatmul.mubr.msk.f32.vlgmr.msra.gmra.mrb[12].mxu1 %vm157_vm2, %v1697_v29  ;;  %v2114_v29 = vld [vmem:[%s3932_s9 + $0x8] sm:$0xff] }
0x17c0   :  { %2918 = vmatpush3.bf16.msra.mxu1 %v3545_v60  ;;  %2711 = vmatprep.mubr.msk.f32.mxu1 %vm3298_vm0, %v3299_v1 }
0x17c1   :  { %v1889_v28 = vpop.permute.xlu1 %1888  ;;  %2919 = vmatprep.subr.bf16.mxu1 %v3297_v0 }
0x17c2   :  { %v1891_v32 = vadd.f32 %v1889_v28, %v1881_v30  ;;  %v2935_v30 = vpack.c.bf16 %v2114_v29, %v2113_v22 }
0x17c4   :  { %3080 = vtanh.f32 %v1891_v32  ;;  %2921 = vmatpush3.bf16.msra.mxu1 %v3548_v62 }
0x17c5   :  { %2922 = vmatprep.subr.bf16.mxu1 %v3297_v0 }
0x17c8   :  { %2924 = vmatpush3.bf16.msra.mxu1 %v3552_v3 }
0x17c9   :  { %2925 = vmatprep.subr.bf16.mxu1 %v3297_v0 }
0x17cc   :  { %2927 = vmatpush3.bf16.msra.mxu1 %v3556_v8 }
0x17cd   :  { %2934 = vmatprep.subr.bf16.mxu1 %v3297_v0 }
0x17ce   :  { %v3081_v60 = vpop.eup %3080 }
0x17cf   :  { %1894 = vrot.lane.b32.xlu1 %v3081_v60, %s3300_s23 }
0x1841   :  { %v1895_v34 = vpop.permute.xlu1 %1894 }
0x1842   :  { %v1897_v31 = vmul.f32 %v3079_v25, %v1895_v34  ;;  %v2030_v25 = vld [vmem:[#allocation11 + $0x18] sm:$0xff]  ;;  %v2115_v34 = vld [vmem:[%s3932_s9 + $0x10] sm:$0xff] }
0x1843   :  { %v2932_v26 = vpack.c.bf16 %v2030_v25, %v2029_v24 }
0x1844   :  { %1899 = vrot.lane.b32.xlu0 %v1897_v31, %s3301_s1 }
0x1845   :  { %2933 = vmatpush3.bf16.msra.mxu0 %v2932_v26 }
0x1892   :  { %v1767_v36 = vpop.f32.mrb[12].mxu1 }
0x1893   :  { %v1768_v62 = vadd.f32 %v3101_v37, %v1767_v36  ;;  %v2675_v35 = vpop.f32.mrb[13].mxu1 }
0x1895   :  { %3082 = vtanh.f32 %v1768_v62  ;;  %v2247_v39 = vmul.f32 -1.442695, %v1768_v62 }
0x1897   :  { %3084 = vpow2.f32 %v2247_v39 }
0x189f   :  { %v3083_v38 = vpop.eup %3082 }
0x18a0   :  { %1780 = vrot.lane.b32.xlu0 %v3083_v38, %s3300_s23  ;;  %v2254_v38 = vld [vmem:[%s3933_s10] ss:$0 sm:$0xff] }
0x18a1   :  { %v3085_v40 = vpop.eup %3084 }
0x18a2   :  { %v1774_v41 = vadd.f32 1.0, %v3085_v40 }
0x18a4   :  { %3086 = vrcp.f32 %v1774_v41 }
0x18ae   :  { %v3087_v47 = vpop.eup %3086 }
0x18af   :  { %v1778_v5 = vmul.f32 %v3087_v47, %v3847_v2 }
0x18b6   :  { %v1900_v3 = vpop.permute.xlu0 %1899 }
0x18b7   :  { %v1902_v8 = vsel %vm149_vm1, %v1900_v3, 0.0 }
0x18b8   :  { %1903 = vadd.xlane.f32.xlu1 %v1902_v8 }
0x1912   :  { %v1781_v46 = vpop.permute.xlu0 %1780 }
0x1913   :  { %v1783_v48 = vmul.f32 %v3087_v47, %v1781_v46 }
0x1945   :  { %v1904_v42 = vpop.xlane.xlu1 %1903 }
0x1946   :  { %v1905_v43 = vmul.f32 0.03125, %v1904_v42 }
0x1948   :  { %v1906_v44 = vsub.f32 %v1897_v31, %v1905_v43  ;;  %v2116_v31 = vld [vmem:[%s3932_s9 + $0x18] sm:$0xff]  ;;  %s3256_s9 = scalar_lea.vmem %s2205_s19, 128 }
0x1949   :  { %v2938_v36 = vpack.c.bf16 %v2116_v31, %v2115_v34  ;;  %p3257_p0 = scmp.ne.s32.totalorder %s2205_s19, %s3256_s9  ;;  %p3262_p2 = scmp.lt.s32.totalorder %s3256_s9, %s3256_s9 }
0x194a   :  { %v1907_v45 = vmul.f32 %v1906_v44, %v1906_v44 }
0x194b   :  { %p3263_p3 = por %p3262_p2, %p3261_p1 }
0x194c   :  { %1909 = vrot.lane.b32.xlu0 %v1907_v45, %s3301_s1 }
0x194d   :  { %p3264_p4 = pnand %p3263_p3, %p3257_p0 }
0x1950   :  { %1785 = vrot.lane.b32.xlu0 %v1783_v48, %s3301_s1 }
0x19be   :  { %v1910_v33 = vpop.permute.xlu0 %1909 }
0x19bf   :  { %v1912_v49 = vsel %vm149_vm1, %v1910_v33, 0.0 }
0x19c0   :  { %1913 = vadd.xlane.f32.xlu0 %v1912_v49 }
0x19c2   :  { %v1786_v50 = vpop.permute.xlu0 %1785 }
0x19c3   :  { %v1788_v51 = vadd.f32 %v1786_v50, %v1778_v5 }
0x19c5   :  { %3088 = vtanh.f32 %v1788_v51 }
0x19cf   :  { %v3089_v52 = vpop.eup %3088 }
0x19d0   :  { %1791 = vrot.lane.b32.xlu1 %v3089_v52, %s3300_s23 }
0x1a42   :  { %v1792_v54 = vpop.permute.xlu1 %1791 }
0x1a43   :  { %v1794_v55 = vmul.f32 %v3087_v47, %v1792_v54 }
0x1a45   :  { %1926 = vrot.lane.b32.xlu1 %v1794_v55, %s3300_s23 }
0x1a4d   :  { %v1914_v7 = vpop.xlane.xlu0 %1913 }
0x1a4e   :  { %v1915_v56 = vmul.f32 0.03125, %v1914_v7 }
0x1a50   :  { %v1916_v10 = vadd.f32 1e-05, %v1915_v56 }
0x1a52   :  { %3090 = vrsqrt.f32 %v1916_v10 }
0x1a5c   :  { %v3091_v58 = vpop.eup %3090 }
0x1a5d   :  { %v1918_v13 = vmul.f32 %v3091_v58, %v1906_v44 }
0x1a5f   :  { %v1919_v61 = vmul.f32 %v1918_v13, %v3542_v53 }
0x1a61   :  { %v1920_v63 = vadd.f32 %v1919_v61, %v3561_v17 }
0x1a63   :  { %1922 = vrot.lane.b32.xlu0 %v1920_v63, %s3301_s1 }
0x1ab7   :  { %v1927_v2 = vpop.permute.xlu1 %1926 }
0x1ad5   :  { %v1923_v9 = vpop.permute.xlu0 %1922 }
0x1ad6   :  { %v1929_v11 = vsel %vm149_vm1, %v1923_v9, %v1927_v2 }
0x1ad7   :  { %2712 = vmatmul.mubr.msk.f32.vlgmr.msra.gmra.mrb[14].mxu1 %vm157_vm2, %v1929_v11 }
0x1ad8   :  { %2733 = vmatprep.mubr.msk.f32.mxu1 %vm3298_vm0, %v3299_v1  ;;  %2936 = vmatpush3.bf16.msra.mxu1 %v2935_v30 }
0x1ad9   :  { %2937 = vmatprep.subr.bf16.mxu1 %v3297_v0 }
0x1adc   :  { %2939 = vmatpush3.bf16.msra.mxu1 %v2938_v36 }
0x1baa   :  { %v1999_v14 = vpop.f32.mrb[14].mxu1 }
0x1bab   :  { %v2000_v15 = vadd.f32 %v3101_v37, %v1999_v14  ;;  %v2713_v57 = vpop.f32.mrb[15].mxu1  ;;  %v2252_v37 = vld [vmem:[#allocation13] ss:$0 sm:$0xff] }
0x1bad   :  { %3092 = vtanh.f32 %v2000_v15  ;;  %v2251_v53 = vmul.f32 -1.442695, %v2000_v15 }
0x1baf   :  { %3094 = vpow2.f32 %v2251_v53 }
0x1bb7   :  { %v3093_v59 = vpop.eup %3092 }
0x1bb8   :  { %2012 = vrot.lane.b32.xlu1 %v3093_v59, %s3300_s23 }
0x1bb9   :  { %v3095_v17 = vpop.eup %3094 }
0x1bba   :  { %v2006_v18 = vadd.f32 1.0, %v3095_v17 }
0x1bbc   :  { %3096 = vrcp.f32 %v2006_v18 }
0x1bc6   :  { %v3097_v12 = vpop.eup %3096 }
0x1bc7   :  { %v2010_v6 = vmul.f32 %v3097_v12, %v1788_v51 }
0x1c2a   :  { %v2013_v19 = vpop.permute.xlu1 %2012 }
0x1c2b   :  { %v2015_v20 = vmul.f32 %v3097_v12, %v2013_v19 }
0x1c2d   :  { %2017 = vrot.lane.b32.xlu1 %v2015_v20, %s3301_s1 }
0x1c9f   :  { %v2018_v4 = vpop.permute.xlu1 %2017 }
0x1ca0   :  { %v2020_v1 = vadd.f32 %v2018_v4, %v2010_v6 }
0x1ca2   :  { %3098 = vtanh.f32 %v2020_v1 }
0x1cac   :  { %v3099_v27 = vpop.eup %3098 }
0x1cad   :  { %2023 = vrot.lane.b32.xlu1 %v3099_v27, %s3300_s23 }
0x1d1f   :  { %v2024_v28 = vpop.permute.xlu1 %2023 }
0x1d20   :  { %v2026_v32 = vmul.f32 %v3097_v12, %v2024_v28 }
0x1d22   :  { %2039 = vrot.lane.b32.xlu0 %v2026_v32, %s3301_s1 }
0x1d94   :  { %v2040_v60 = vpop.permute.xlu0 %2039 }
0x1d95   :  { %2723 = vmatmul.mubr.msk.f32.vlgmr.msra.gmra.mrb[16].mxu0 %vm149_vm1, %v2040_v60 }
0x1e68   :  { %v2109_v62 = vpop.f32.mrb[16].mxu0 }
0x1e69   :  { %v2110_v0 = vadd.f32 %v2252_v37, %v2109_v62  ;;  %v2724_v35 = vpop.f32.mrb[17].mxu0 }
0x1e6b   :  { %2734 = vmatmul.mubr.msk.f32.vlgmr.msra.gmra.mrb[16].mxu1 %vm149_vm1, %v2110_v0 }
0x1f3e   :  { %v2193_v3 = vpop.f32.mrb[16].mxu1 }
0x1f3f   :  { %v2194_v8 = vadd.f32 %v2254_v38, %v2193_v3  ;;  %v2735_v39 = vpop.f32.mrb[17].mxu1 }
0x1f41   :  { %2197 = vst [vmem:[#allocation14] sm:$0xff] %v2194_v8 }
0x1f42   :  { %3267 = shalt.err (!%p3264_p4)
}
0x1f43   :  { %s3268_s0 = scalar_lea.hbm %s3934_s11, 128 }
0x1f44   :  { %p3269_p5 = scmp.ne.s32.totalorder %s3934_s11, %s3268_s0  ;;  %p3272_p6 = scmp.lt.u32.totalorder %s3268_s0, %s3934_s11 }
0x1f46   :  { %p3274_p7 = pnand %p3272_p6, %p3269_p5 }
0x1f48   :  { %3277 = shalt.err (!%p3274_p7)
}
0x1f49   :  { %2207 = dma.vmem_to_hbm [thread:$0]  %s2205_s19, 128, %s3934_s11, [#allocation4]  }
0x1f4a   :  { %3286 = dma.done.wait [#allocation4], 128  }
0x1f4b   :  { %3287 = vsyncadd [#allocation4], 4294967168 }
0x1f4c   :  { %2211 = vsyncpa [#allocation3], 1 }
0x1f4d   :  { %2212 = vsyncpa [#allocation6], 1 }
0x1f4e   :  { %2213 = vsyncpa [#allocation9], 1 }
0x1f4f   :  { %2214 = vsyncpa [#allocation12], 1 }
0x1f50   :  { %2215 = vsyncpa [#allocation4], 1 }

</bundles_post_ra>
